<compile_context>
chip_gen: v7x
topology: tpu7x:2x2x1
jax: 0.10.0
libtpu: 0.0.40
codegen_flags: <defaults>
</compile_context>

<pallas_src>
import functools

import jax
import jax.numpy as jnp
from jax import lax
from jax.experimental import pallas as pl
from jax.experimental.pallas import tpu as pltpu


# ------------------------------- small helpers -------------------------------
_BUFFERED1_MIN_BYTES = 1 << 20     # only single-buffer *large* invariant blocks


def _round_up(x, m):
    return (x + m - 1) // m * m


def _vmem_limit_bytes():
    """Per-generation scoped-VMEM budget (None -> leave compiler default)."""
    try:
        kind = jax.devices()[0].device_kind.lower()
    except Exception:
        kind = ""
    if "v7" in kind:                                   # 64 MiB physical VMEM
        return 32 * 1024 * 1024
    if any(v in kind for v in ("v4", "v5", "v6")):     # 128 MiB physical VMEM
        return 96 * 1024 * 1024
    return None


def _compiler_params():
    kw = dict(dimension_semantics=("parallel", "parallel"))
    vl = _vmem_limit_bytes()
    if vl is not None:
        kw["vmem_limit_bytes"] = vl
    return pltpu.CompilerParams(**kw)


def _spec(block_shape, index_map, *, invariant=False, nbytes=0):
    """BlockSpec; large operands whose block never changes over the grid are
    single-buffered so their VMEM double-buffer is not wasted."""
    if invariant and nbytes >= _BUFFERED1_MIN_BYTES:
        try:
            return pl.BlockSpec(block_shape, index_map,
                                pipeline_mode=pl.Buffered(1))
        except Exception:          # older jax: no pipeline_mode / Buffered
            pass
    return pl.BlockSpec(block_shape, index_map)


def _pick_cout_tile(cp, m, *, kin, act_bytes, out_bytes):
    """Largest Cout tile whose per-step working set fits the VMEM budget."""
    budget = int(0.45 * (_vmem_limit_bytes() or 32 * 1024 * 1024))
    for ct in (512, 256, 128):
        if cp % ct:
            continue
        work = (2 * act_bytes              # activation block (double buffered)
                + 2 * 9 * kin * ct * 2     # bf16 weight taps (double buffered)
                + 2 * m * ct * out_bytes   # output block (double buffered)
                + m * ct * 4)              # f32 accumulator
        if work <= budget:
            return ct
    return 128


# ----------------------------- Pallas kernels --------------------------------
def _accum_conv3x3(phase_refs, w_ref, *, ho, wo, stride):
    """Per-tap accumulation of a 3x3 conv read directly from (phase-split) NHWC
    activation refs: 9 MXU matmuls on integer-level bf16, f32 accumulation."""
    m = ho * wo
    cin = w_ref.shape[1]
    cout = w_ref.shape[2]
    acc = jnp.zeros((m, cout), jnp.float32)
    for t in range(9):
        dy, dx = divmod(t, 3)
        ref = phase_refs[(dy % stride) * stride + (dx % stride)]
        xt = ref[0, pl.ds(dy // stride, ho), pl.ds(dx // stride, wo), :]
        acc = acc + jnp.dot(xt.reshape(m, cin), w_ref[t],
                            preferred_element_type=jnp.float32)
    return acc


def _conv1_kernel(*refs, n_phase, ho, wo, stride, a_levels):
    """conv3x3(stride) -> folded BN1 -> ReLU -> DoReFa act-quant (int levels;
    the /n_a is folded into the next conv's BN scale)."""
    phase_refs = refs[:n_phase]
    w_ref, s_ref, b_ref, o_ref = refs[n_phase:]
    acc = _accum_conv3x3(phase_refs, w_ref, ho=ho, wo=wo, stride=stride)
    y = acc * s_ref[...] + b_ref[...]
    # clip to [0,1] subsumes the ReLU.
    o_ref[0] = jnp.round(jnp.clip(y, 0.0, 1.0) * a_levels).astype(o_ref.dtype)


def _conv2_scconv_kernel(x_ref, w_ref, s_ref, xsc_ref, wsc_ref, ssc_ref, b_ref,
                         o_ref, *, ho, wo, off):
    """conv3x3(s=1)+BN2 with the conv1x1(stride)+BN_sc shortcut fused, add, ReLU."""
    m = ho * wo
    acc = _accum_conv3x3((x_ref,), w_ref, ho=ho, wo=wo, stride=1)
    y = acc * s_ref[...]
    xsc = xsc_ref[0, pl.ds(off, ho), pl.ds(off, wo), :]
    y = y + jnp.dot(xsc.reshape(m, xsc_ref.shape[3]), wsc_ref[...],
                    preferred_element_type=jnp.float32) * ssc_ref[...]
    o_ref[0] = jnp.maximum(y + b_ref[...], 0.0).astype(o_ref.dtype)


def _conv2_identity_kernel(x_ref, w_ref, s_ref, b_ref, res_ref, o_ref, *, ho, wo):
    """conv3x3(s=1)+BN2, identity-residual add, ReLU."""
    acc = _accum_conv3x3((x_ref,), w_ref, ho=ho, wo=wo, stride=1)
    y = acc * s_ref[...] + b_ref[...] + res_ref[0]
    o_ref[0] = jnp.maximum(y, 0.0).astype(o_ref.dtype)


# ------------------------------ pallas wrappers -------------------------------
def conv1_bn_relu_quant(phases, w_taps, scale, bias, *, ho, wo, stride, a_levels):
    """phases: stride*stride tensors of (N, PH, PW, Cin) bf16 integer levels
    (stride==1 -> just the spatially padded input).  Returns (N, Ho*Wo, Cp)
    bf16 integer levels (conv2's already-quantized input)."""
    n = phases[0].shape[0]
    cin = phases[0].shape[-1]
    cp = w_taps.shape[2]
    m = ho * wo
    act_bytes = sum(int(p.size) // n * 2 for p in phases)
    ct = _pick_cout_tile(cp, m, kin=cin, act_bytes=act_bytes, out_bytes=2)
    n_ct = cp // ct
    grid = (n, n_ct)

    in_specs = [_spec((1,) + tuple(p.shape[1:]), lambda i, c: (i, 0, 0, 0),
                      invariant=(n == 1), nbytes=int(p.size) // n * 2)
                for p in phases]
    in_specs += [
        _spec((9, cin, ct), lambda i, c: (0, 0, c),
              invariant=(n_ct == 1), nbytes=9 * cin * ct * 2),
        pl.BlockSpec((1, ct), lambda i, c: (0, c)),
        pl.BlockSpec((1, ct), lambda i, c: (0, c)),
    ]
    cost = pl.CostEstimate(
        flops=int(2 * n * m * 9 * cin * cp), transcendentals=0,
        bytes_accessed=int(n * act_bytes + w_taps.size * 2 + n * m * cp * 2))
    return pl.pallas_call(
        functools.partial(_conv1_kernel, n_phase=len(phases), ho=ho, wo=wo,
                          stride=stride, a_levels=a_levels),
        out_shape=jax.ShapeDtypeStruct((n, m, cp), jnp.bfloat16),
        grid=grid,
        in_specs=in_specs,
        out_specs=pl.BlockSpec((1, m, ct), lambda i, c: (i, 0, c)),
        compiler_params=_compiler_params(),
        cost_estimate=cost,
    )(*phases, w_taps, scale, bias)


def conv2_bn_scconv_relu(y1p, w2_taps, s2, sc_phase, wsc, ssc, bias, *,
                         ho, wo, off, out_dtype):
    n, hp, wp, cmid = y1p.shape
    cp = w2_taps.shape[2]
    cin_sc = sc_phase.shape[-1]
    m = ho * wo
    obytes = jnp.dtype(out_dtype).itemsize
    act_bytes = hp * wp * cmid * 2 + int(sc_phase.size) // n * 2
    ct = _pick_cout_tile(cp, m, kin=cmid + cin_sc, act_bytes=act_bytes,
                         out_bytes=obytes)
    n_ct = cp // ct
    grid = (n, n_ct)
    in_specs = [
        _spec((1, hp, wp, cmid), lambda i, c: (i, 0, 0, 0),
              invariant=(n == 1), nbytes=hp * wp * cmid * 2),
        _spec((9, cmid, ct), lambda i, c: (0, 0, c),
              invariant=(n_ct == 1), nbytes=9 * cmid * ct * 2),
        pl.BlockSpec((1, ct), lambda i, c: (0, c)),
        _spec((1,) + tuple(sc_phase.shape[1:]), lambda i, c: (i, 0, 0, 0),
              invariant=(n == 1), nbytes=int(sc_phase.size) // n * 2),
        _spec((cin_sc, ct), lambda i, c: (0, c),
              invariant=(n_ct == 1), nbytes=cin_sc * ct * 2),
        pl.BlockSpec((1, ct), lambda i, c: (0, c)),
        pl.BlockSpec((1, ct), lambda i, c: (0, c)),
    ]
    cost = pl.CostEstimate(
        flops=int(2 * n * m * (9 * cmid + cin_sc) * cp), transcendentals=0,
        bytes_accessed=int(n * act_bytes + (w2_taps.size + wsc.size) * 2
                           + n * m * cp * obytes))
    return pl.pallas_call(
        functools.partial(_conv2_scconv_kernel, ho=ho, wo=wo, off=off),
        out_shape=jax.ShapeDtypeStruct((n, m, cp), out_dtype),
        grid=grid,
        in_specs=in_specs,
        out_specs=pl.BlockSpec((1, m, ct), lambda i, c: (i, 0, c)),
        compiler_params=_compiler_params(),
        cost_estimate=cost,
    )(y1p, w2_taps, s2, sc_phase, wsc, ssc, bias)


def conv2_bn_identity_relu(y1p, w2_taps, s2, b2, res, *, ho, wo, out_dtype):
    n, hp, wp, cmid = y1p.shape
    cp = w2_taps.shape[2]
    m = ho * wo
    obytes = jnp.dtype(out_dtype).itemsize
    act_bytes = hp * wp * cmid * 2 + m * cp * 4
    ct = _pick_cout_tile(cp, m, kin=cmid, act_bytes=act_bytes, out_bytes=obytes)
    n_ct = cp // ct
    grid = (n, n_ct)
    in_specs = [
        _spec((1, hp, wp, cmid), lambda i, c: (i, 0, 0, 0),
              invariant=(n == 1), nbytes=hp * wp * cmid * 2),
        _spec((9, cmid, ct), lambda i, c: (0, 0, c),
              invariant=(n_ct == 1), nbytes=9 * cmid * ct * 2),
        pl.BlockSpec((1, ct), lambda i, c: (0, c)),
        pl.BlockSpec((1, ct), lambda i, c: (0, c)),
        pl.BlockSpec((1, m, ct), lambda i, c: (i, 0, c)),
    ]
    cost = pl.CostEstimate(
        flops=int(2 * n * m * 9 * cmid * cp), transcendentals=0,
        bytes_accessed=int(n * act_bytes + w2_taps.size * 2 + n * m * cp * obytes))
    return pl.pallas_call(
        functools.partial(_conv2_identity_kernel, ho=ho, wo=wo),
        out_shape=jax.ShapeDtypeStruct((n, m, cp), out_dtype),
        grid=grid,
        in_specs=in_specs,
        out_specs=pl.BlockSpec((1, m, ct), lambda i, c: (i, 0, c)),
        compiler_params=_compiler_params(),
        cost_estimate=cost,
    )(y1p, w2_taps, s2, b2, res)


# ------------------------------ glue helpers ---------------------------------
def dorefa_quantize_w_int(w, nbit):
    """Integer-level DoReFa weights in [-n, n]; true weight = result / n."""
    n = 2.0 ** nbit - 1.0
    wt = jnp.tanh(w)
    wt = wt / (2.0 * jnp.max(jnp.abs(wt))) + 0.5
    return 2.0 * jnp.round(wt * n) - n


def w3x3_to_taps(w_oihw, cin_pad, cout_pad):
    """(Cout,Cin,3,3) -> (9, cin_pad, cout_pad) bf16, tap-major (dy*3+dx)."""
    cout, cin, kh, kw = w_oihw.shape
    m = jnp.transpose(w_oihw, (2, 3, 1, 0)).reshape(kh * kw, cin, cout)
    m = jnp.pad(m, ((0, 0), (0, cin_pad - cin), (0, cout_pad - cout)))
    return m.astype(jnp.bfloat16)


def w1x1_to_mat(w_oihw, cout_pad):
    """(Cout,Cin,1,1) -> (Cin, cout_pad) bf16."""
    cout, cin = w_oihw.shape[:2]
    m = jnp.transpose(w_oihw.reshape(cout, cin), (1, 0))
    return jnp.pad(m, ((0, 0), (0, cout_pad - cout))).astype(jnp.bfloat16)


def fold_bn(gamma, beta, mean, var, cout_pad, *, extra_scale=1.0, eps=1e-5):
    s = gamma / jnp.sqrt(var + eps)
    b = beta - mean * s
    s = s * extra_scale                  # fold 1/(n_a*n_w) quant scale here
    pad = cout_pad - s.shape[0]
    return (jnp.pad(s, (0, pad)).reshape(1, -1).astype(jnp.float32),
            jnp.pad(b, (0, pad)).reshape(1, -1).astype(jnp.float32))


def make_block_params(raw, *, wbit, abit, planes, cin):
    n_a = 2.0 ** abit - 1.0
    n_w = 2.0 ** wbit - 1.0
    assert abit <= 8 and wbit <= 8, "integer levels must be bf16-exact"
    assert n_a * n_w * 9 * max(cin, planes) < 2 ** 24, \
        "f32 accumulation would leave the exact-integer range"
    inv = 1.0 / (n_a * n_w)
    cp = _round_up(planes, 128)          # lane-dense output channel padding
    s1, b1 = fold_bn(*raw["bn1"], cp, extra_scale=inv)
    s2, b2 = fold_bn(*raw["bn2"], cp, extra_scale=inv)
    params = {
        "w1": w3x3_to_taps(dorefa_quantize_w_int(raw["w1"], wbit), cin, cp),
        "w2": w3x3_to_taps(dorefa_quantize_w_int(raw["w2"], wbit), cp, cp),
        "s1": s1, "b1": b1, "s2": s2, "b2": b2,
    }
    if "w_sc" in raw:
        ssc, bsc = fold_bn(*raw["bn_sc"], cp, extra_scale=inv)
        params["w_sc"] = w1x1_to_mat(dorefa_quantize_w_int(raw["w_sc"], wbit), cp)
        params["s_sc"] = ssc
        params["b2_bsc"] = b2 + bsc
    return params


# ---------------------------- BasicBlock forward ------------------------------
def basic_block_forward(x_nchw, params, *, stride, abit, planes,
                        out_dtype=jnp.float32):
    x = jnp.transpose(x_nchw, (0, 2, 3, 1))             # NCHW -> NHWC
    n, h, w, cin = x.shape
    n_a = 2.0 ** abit - 1.0
    ho = (h - 1) // stride + 1
    wo = (w - 1) // stride + 1

    # DoReFa activation quantization of the block input, ONCE (integer levels).
    xq = jnp.round(jnp.clip(x, 0.0, 1.0) * n_a).astype(jnp.bfloat16)
    xp = jnp.pad(xq, ((0, 0), (1, 1), (1, 1), (0, 0)))  # conv3x3 halo

    # Phase-split the (rare) strided conv so the kernel only needs contiguous
    # reads; total HBM bytes stay 1x.  stride==1 keeps the single padded tensor.
    if stride == 1:
        phases = [xp]
    else:
        ph = ho + 2 // stride
        pw = wo + 2 // stride
        phases = []
        for ry in range(stride):
            for rx in range(stride):
                p = xp[:, ry::stride, rx::stride, :][:, :ph, :pw, :]
                p = jnp.pad(p, ((0, 0), (0, ph - p.shape[1]),
                                (0, pw - p.shape[2]), (0, 0)))
                phases.append(p)

    # conv3x3(stride) + BN1 + ReLU + quantization of conv2's input, fused.
    y1 = conv1_bn_relu_quant(phases, params["w1"], params["s1"], params["b1"],
                             ho=ho, wo=wo, stride=stride, a_levels=n_a)
    cp = y1.shape[-1]
    # Lane-dense channel-padded intermediate; spatial halo pad for conv2.
    # TODO(synk): the halo pad costs one extra pass over the intermediate; it
    # could be written directly by conv1's out_spec.
    y1p = jnp.pad(y1.reshape(n, ho, wo, cp), ((0, 0), (1, 1), (1, 1), (0, 0)))

    if "w_sc" in params:
        # conv1x1(stride) + BN shortcut fused into conv2's kernel (reads the
        # already-quantized input phase directly, offset picks the 1x1 taps).
        sc_phase = phases[(1 % stride) * stride + (1 % stride)]
        out = conv2_bn_scconv_relu(y1p, params["w2"], params["s2"],
                                   sc_phase, params["w_sc"], params["s_sc"],
                                   params["b2_bsc"], ho=ho, wo=wo,
                                   off=1 // stride, out_dtype=out_dtype)
    else:
        assert stride == 1 and cin == planes, (
            "identity shortcut requires stride==1 and in_planes==planes")
        res = x.reshape(n, h * w, cin)
        # TODO(synk): pad residual channels inside the kernel instead of in HBM
        # (only costs extra when planes is not a multiple of 128).
        res = jnp.pad(res, ((0, 0), (0, 0), (0, cp - cin))).astype(jnp.float32)
        out = conv2_bn_identity_relu(y1p, params["w2"], params["s2"],
                                     params["b2"], res,
                                     ho=ho, wo=wo, out_dtype=out_dtype)

    out = out[:, :, :planes].reshape(n, ho, wo, planes)
    return jnp.transpose(out, (0, 3, 1, 2)).astype(jnp.float32)   # NHWC -> NCHW


# ------------------------- pure-JAX reference (NCHW) --------------------------
def ref_forward(x, raw, *, stride, wbit, abit, eps=1e-5):
    n_a = 2.0 ** abit - 1.0
    n_w = 2.0 ** wbit - 1.0

    def qa(a):
        return jnp.round(jnp.clip(a, 0.0, 1.0) * n_a) / n_a

    def qw(w):
        wt = jnp.tanh(w)
        wt = wt / (2.0 * jnp.max(jnp.abs(wt))) + 0.5
        return 2.0 * (jnp.round(wt * n_w) / n_w) - 1.0

    def conv(a, w, s, pad):
        return lax.conv_general_dilated(
            a, w, window_strides=(s, s), padding=((pad, pad), (pad, pad)),
            dimension_numbers=("NCHW", "OIHW", "NCHW"),
            precision=lax.Precision.HIGHEST)

    def bn(a, g, b, m, v):
        g, b, m, v = (t[None, :, None, None] for t in (g, b, m, v))
        return (a - m) / jnp.sqrt(v + eps) * g + b

    out = jnp.maximum(bn(conv(qa(x), qw(raw["w1"]), stride, 1), *raw["bn1"]), 0.0)
    out = bn(conv(qa(out), qw(raw["w2"]), 1, 1), *raw["bn2"])
    if "w_sc" in raw:
        sc = bn(conv(qa(x), qw(raw["w_sc"]), stride, 0), *raw["bn_sc"])
    else:
        sc = x
    return jnp.maximum(out + sc, 0.0)


# ------------------------------------ main ------------------------------------
if __name__ == "__main__":
    key = jax.random.PRNGKey(0)
    keys = jax.random.split(key, 8)

    N, Cin, H, W = 2, 4, 16, 16
    planes, stride = 8, 2          # stride != 1  =>  conv1x1 + BN shortcut path
    wbit = abit = 4

    x = jax.random.normal(keys[0], (N, Cin, H, W), jnp.float32)

    def bn_params(k, c):
        k1, k2, k3, k4 = jax.random.split(k, 4)
        gamma = 1.0 + 0.1 * jax.random.normal(k1, (c,), jnp.float32)
        beta = 0.1 * jax.random.normal(k2, (c,), jnp.float32)
        mean = 0.1 * jax.random.normal(k3, (c,), jnp.float32)
        var = jnp.abs(1.0 + 0.1 * jax.random.normal(k4, (c,), jnp.float32))
        return (gamma, beta, mean, var)

    w1 = 0.2 * jax.random.normal(keys[1], (planes, Cin, 3, 3), jnp.float32)
    w2 = 0.2 * jax.random.normal(keys[2], (planes, planes, 3, 3), jnp.float32)
    w_sc = 0.2 * jax.random.normal(keys[3], (planes, Cin, 1, 1), jnp.float32)

    raw = {"w1": w1, "bn1": bn_params(keys[4], planes),
           "w2": w2, "bn2": bn_params(keys[5], planes),
           "w_sc": w_sc, "bn_sc": bn_params(keys[6], planes)}

    # Precompute integer-level weights and folded BN affines (inference mode).
    params = make_block_params(raw, wbit=wbit, abit=abit, planes=planes, cin=Cin)

    fwd = jax.jit(functools.partial(basic_block_forward, stride=stride,
                                    abit=abit, planes=planes))
    out = jax.block_until_ready(fwd(x, params))

    ref = ref_forward(x, raw, stride=stride, wbit=wbit, abit=abit)
    assert out.shape == (N, planes, H // stride, W // stride), out.shape
    err = float(jnp.max(jnp.abs(out - ref)))
    assert err < 1e-3, f"max abs error vs reference: {err}"
    print("KERNEL_OK")
</pallas_src>

<mosaic_0001>
module attributes {stable_mosaic.version = 11 : i64} {
  func.func @_conv2_scconv_kernel(%arg0: i32, %arg1: i32, %arg2: memref<1x10x10x128xbf16, #tpu.memory_space<vmem>>, %arg3: memref<9x128x128xbf16, #tpu.memory_space<vmem>>, %arg4: memref<1x128xf32, #tpu.memory_space<vmem>>, %arg5: memref<1x9x9x4xbf16, #tpu.memory_space<vmem>>, %arg6: memref<4x128xbf16, #tpu.memory_space<vmem>>, %arg7: memref<1x128xf32, #tpu.memory_space<vmem>>, %arg8: memref<1x128xf32, #tpu.memory_space<vmem>>, %arg9: memref<1x64x128xf32, #tpu.memory_space<vmem>>) attributes {dimension_semantics = [#tpu.dimension_semantics<parallel>, #tpu.dimension_semantics<parallel>], iteration_bounds = array<i64: 2, 1>, scalar_prefetch = 0 : i64, scratch_operands = 0 : i64, tpu.core_type = #tpu.core_type<tc>, window_params = [{transform_indices = @transform_0, window_bounds = array<i64: 1, 10, 10, 128>}, {transform_indices = @transform_1, window_bounds = array<i64: 9, 128, 128>}, {transform_indices = @transform_2, window_bounds = array<i64: 1, 128>}, {transform_indices = @transform_3, window_bounds = array<i64: 1, 9, 9, 4>}, {transform_indices = @transform_4, window_bounds = array<i64: 4, 128>}, {transform_indices = @transform_5, window_bounds = array<i64: 1, 128>}, {transform_indices = @transform_6, window_bounds = array<i64: 1, 128>}, {transform_indices = @transform_7, window_bounds = array<i64: 1, 64, 128>}]} {
    %cst = arith.constant 0.000000e+00 : f32
    %0 = vector.broadcast %cst : f32 to vector<64x128xf32>
    %c0 = arith.constant 0 : index
    %c0_0 = arith.constant 0 : index
    %c0_1 = arith.constant 0 : index
    %c0_2 = arith.constant 0 : index
    %1 = vector.load %arg2[%c0, %c0_0, %c0_1, %c0_2] : memref<1x10x10x128xbf16, #tpu.memory_space<vmem>>, vector<1x8x8x128xbf16>
    %2 = vector.shape_cast %1 : vector<1x8x8x128xbf16> to vector<8x8x128xbf16>
    %3 = vector.shape_cast %2 : vector<8x8x128xbf16> to vector<64x128xbf16>
    %c0_3 = arith.constant 0 : index
    %c0_4 = arith.constant 0 : index
    %c0_5 = arith.constant 0 : index
    %4 = vector.load %arg3[%c0_3, %c0_4, %c0_5] : memref<9x128x128xbf16, #tpu.memory_space<vmem>>, vector<1x128x128xbf16>
    %5 = vector.shape_cast %4 : vector<1x128x128xbf16> to vector<128x128xbf16>
    %cst_6 = arith.constant dense<0.000000e+00> : vector<64x128xf32>
    %6 = tpu.matmul %3, %5, %cst_6 {dimension_numbers = #tpu.dot_dimension_numbers<[1], [0], [0], [1], [0, 0, 1, 1], [], []>} : vector<64x128xbf16>, vector<128x128xbf16>, vector<64x128xf32> -> vector<64x128xf32>
    %7 = arith.addf %0, %6 : vector<64x128xf32>
    %c0_7 = arith.constant 0 : index
    %c0_8 = arith.constant 0 : index
    %c1 = arith.constant 1 : index
    %c0_9 = arith.constant 0 : index
    %8 = vector.load %arg2[%c0_7, %c0_8, %c1, %c0_9] : memref<1x10x10x128xbf16, #tpu.memory_space<vmem>>, vector<1x8x8x128xbf16>
    %9 = vector.shape_cast %8 : vector<1x8x8x128xbf16> to vector<8x8x128xbf16>
    %10 = vector.shape_cast %9 : vector<8x8x128xbf16> to vector<64x128xbf16>
    %c1_10 = arith.constant 1 : index
    %c0_11 = arith.constant 0 : index
    %c0_12 = arith.constant 0 : index
    %11 = vector.load %arg3[%c1_10, %c0_11, %c0_12] : memref<9x128x128xbf16, #tpu.memory_space<vmem>>, vector<1x128x128xbf16>
    %12 = vector.shape_cast %11 : vector<1x128x128xbf16> to vector<128x128xbf16>
    %cst_13 = arith.constant dense<0.000000e+00> : vector<64x128xf32>
    %13 = tpu.matmul %10, %12, %cst_13 {dimension_numbers = #tpu.dot_dimension_numbers<[1], [0], [0], [1], [0, 0, 1, 1], [], []>} : vector<64x128xbf16>, vector<128x128xbf16>, vector<64x128xf32> -> vector<64x128xf32>
    %14 = arith.addf %7, %13 : vector<64x128xf32>
    %c0_14 = arith.constant 0 : index
    %c0_15 = arith.constant 0 : index
    %c2 = arith.constant 2 : index
    %c0_16 = arith.constant 0 : index
    %15 = vector.load %arg2[%c0_14, %c0_15, %c2, %c0_16] : memref<1x10x10x128xbf16, #tpu.memory_space<vmem>>, vector<1x8x8x128xbf16>
    %16 = vector.shape_cast %15 : vector<1x8x8x128xbf16> to vector<8x8x128xbf16>
    %17 = vector.shape_cast %16 : vector<8x8x128xbf16> to vector<64x128xbf16>
    %c2_17 = arith.constant 2 : index
    %c0_18 = arith.constant 0 : index
    %c0_19 = arith.constant 0 : index
    %18 = vector.load %arg3[%c2_17, %c0_18, %c0_19] : memref<9x128x128xbf16, #tpu.memory_space<vmem>>, vector<1x128x128xbf16>
    %19 = vector.shape_cast %18 : vector<1x128x128xbf16> to vector<128x128xbf16>
    %cst_20 = arith.constant dense<0.000000e+00> : vector<64x128xf32>
    %20 = tpu.matmul %17, %19, %cst_20 {dimension_numbers = #tpu.dot_dimension_numbers<[1], [0], [0], [1], [0, 0, 1, 1], [], []>} : vector<64x128xbf16>, vector<128x128xbf16>, vector<64x128xf32> -> vector<64x128xf32>
    %21 = arith.addf %14, %20 : vector<64x128xf32>
    %c0_21 = arith.constant 0 : index
    %c1_22 = arith.constant 1 : index
    %c0_23 = arith.constant 0 : index
    %c0_24 = arith.constant 0 : index
    %22 = vector.load %arg2[%c0_21, %c1_22, %c0_23, %c0_24] : memref<1x10x10x128xbf16, #tpu.memory_space<vmem>>, vector<1x8x8x128xbf16>
    %23 = vector.shape_cast %22 : vector<1x8x8x128xbf16> to vector<8x8x128xbf16>
    %24 = vector.shape_cast %23 : vector<8x8x128xbf16> to vector<64x128xbf16>
    %c3 = arith.constant 3 : index
    %c0_25 = arith.constant 0 : index
    %c0_26 = arith.constant 0 : index
    %25 = vector.load %arg3[%c3, %c0_25, %c0_26] : memref<9x128x128xbf16, #tpu.memory_space<vmem>>, vector<1x128x128xbf16>
    %26 = vector.shape_cast %25 : vector<1x128x128xbf16> to vector<128x128xbf16>
    %cst_27 = arith.constant dense<0.000000e+00> : vector<64x128xf32>
    %27 = tpu.matmul %24, %26, %cst_27 {dimension_numbers = #tpu.dot_dimension_numbers<[1], [0], [0], [1], [0, 0, 1, 1], [], []>} : vector<64x128xbf16>, vector<128x128xbf16>, vector<64x128xf32> -> vector<64x128xf32>
    %28 = arith.addf %21, %27 : vector<64x128xf32>
    %c0_28 = arith.constant 0 : index
    %c1_29 = arith.constant 1 : index
    %c1_30 = arith.constant 1 : index
    %c0_31 = arith.constant 0 : index
    %29 = vector.load %arg2[%c0_28, %c1_29, %c1_30, %c0_31] : memref<1x10x10x128xbf16, #tpu.memory_space<vmem>>, vector<1x8x8x128xbf16>
    %30 = vector.shape_cast %29 : vector<1x8x8x128xbf16> to vector<8x8x128xbf16>
    %31 = vector.shape_cast %30 : vector<8x8x128xbf16> to vector<64x128xbf16>
    %c4 = arith.constant 4 : index
    %c0_32 = arith.constant 0 : index
    %c0_33 = arith.constant 0 : index
    %32 = vector.load %arg3[%c4, %c0_32, %c0_33] : memref<9x128x128xbf16, #tpu.memory_space<vmem>>, vector<1x128x128xbf16>
    %33 = vector.shape_cast %32 : vector<1x128x128xbf16> to vector<128x128xbf16>
    %cst_34 = arith.constant dense<0.000000e+00> : vector<64x128xf32>
    %34 = tpu.matmul %31, %33, %cst_34 {dimension_numbers = #tpu.dot_dimension_numbers<[1], [0], [0], [1], [0, 0, 1, 1], [], []>} : vector<64x128xbf16>, vector<128x128xbf16>, vector<64x128xf32> -> vector<64x128xf32>
    %35 = arith.addf %28, %34 : vector<64x128xf32>
    %c0_35 = arith.constant 0 : index
    %c1_36 = arith.constant 1 : index
    %c2_37 = arith.constant 2 : index
    %c0_38 = arith.constant 0 : index
    %36 = vector.load %arg2[%c0_35, %c1_36, %c2_37, %c0_38] : memref<1x10x10x128xbf16, #tpu.memory_space<vmem>>, vector<1x8x8x128xbf16>
    %37 = vector.shape_cast %36 : vector<1x8x8x128xbf16> to vector<8x8x128xbf16>
    %38 = vector.shape_cast %37 : vector<8x8x128xbf16> to vector<64x128xbf16>
    %c5 = arith.constant 5 : index
    %c0_39 = arith.constant 0 : index
    %c0_40 = arith.constant 0 : index
    %39 = vector.load %arg3[%c5, %c0_39, %c0_40] : memref<9x128x128xbf16, #tpu.memory_space<vmem>>, vector<1x128x128xbf16>
    %40 = vector.shape_cast %39 : vector<1x128x128xbf16> to vector<128x128xbf16>
    %cst_41 = arith.constant dense<0.000000e+00> : vector<64x128xf32>
    %41 = tpu.matmul %38, %40, %cst_41 {dimension_numbers = #tpu.dot_dimension_numbers<[1], [0], [0], [1], [0, 0, 1, 1], [], []>} : vector<64x128xbf16>, vector<128x128xbf16>, vector<64x128xf32> -> vector<64x128xf32>
    %42 = arith.addf %35, %41 : vector<64x128xf32>
    %c0_42 = arith.constant 0 : index
    %c2_43 = arith.constant 2 : index
    %c0_44 = arith.constant 0 : index
    %c0_45 = arith.constant 0 : index
    %43 = vector.load %arg2[%c0_42, %c2_43, %c0_44, %c0_45] : memref<1x10x10x128xbf16, #tpu.memory_space<vmem>>, vector<1x8x8x128xbf16>
    %44 = vector.shape_cast %43 : vector<1x8x8x128xbf16> to vector<8x8x128xbf16>
    %45 = vector.shape_cast %44 : vector<8x8x128xbf16> to vector<64x128xbf16>
    %c6 = arith.constant 6 : index
    %c0_46 = arith.constant 0 : index
    %c0_47 = arith.constant 0 : index
    %46 = vector.load %arg3[%c6, %c0_46, %c0_47] : memref<9x128x128xbf16, #tpu.memory_space<vmem>>, vector<1x128x128xbf16>
    %47 = vector.shape_cast %46 : vector<1x128x128xbf16> to vector<128x128xbf16>
    %cst_48 = arith.constant dense<0.000000e+00> : vector<64x128xf32>
    %48 = tpu.matmul %45, %47, %cst_48 {dimension_numbers = #tpu.dot_dimension_numbers<[1], [0], [0], [1], [0, 0, 1, 1], [], []>} : vector<64x128xbf16>, vector<128x128xbf16>, vector<64x128xf32> -> vector<64x128xf32>
    %49 = arith.addf %42, %48 : vector<64x128xf32>
    %c0_49 = arith.constant 0 : index
    %c2_50 = arith.constant 2 : index
    %c1_51 = arith.constant 1 : index
    %c0_52 = arith.constant 0 : index
    %50 = vector.load %arg2[%c0_49, %c2_50, %c1_51, %c0_52] : memref<1x10x10x128xbf16, #tpu.memory_space<vmem>>, vector<1x8x8x128xbf16>
    %51 = vector.shape_cast %50 : vector<1x8x8x128xbf16> to vector<8x8x128xbf16>
    %52 = vector.shape_cast %51 : vector<8x8x128xbf16> to vector<64x128xbf16>
    %c7 = arith.constant 7 : index
    %c0_53 = arith.constant 0 : index
    %c0_54 = arith.constant 0 : index
    %53 = vector.load %arg3[%c7, %c0_53, %c0_54] : memref<9x128x128xbf16, #tpu.memory_space<vmem>>, vector<1x128x128xbf16>
    %54 = vector.shape_cast %53 : vector<1x128x128xbf16> to vector<128x128xbf16>
    %cst_55 = arith.constant dense<0.000000e+00> : vector<64x128xf32>
    %55 = tpu.matmul %52, %54, %cst_55 {dimension_numbers = #tpu.dot_dimension_numbers<[1], [0], [0], [1], [0, 0, 1, 1], [], []>} : vector<64x128xbf16>, vector<128x128xbf16>, vector<64x128xf32> -> vector<64x128xf32>
    %56 = arith.addf %49, %55 : vector<64x128xf32>
    %c0_56 = arith.constant 0 : index
    %c2_57 = arith.constant 2 : index
    %c2_58 = arith.constant 2 : index
    %c0_59 = arith.constant 0 : index
    %57 = vector.load %arg2[%c0_56, %c2_57, %c2_58, %c0_59] : memref<1x10x10x128xbf16, #tpu.memory_space<vmem>>, vector<1x8x8x128xbf16>
    %58 = vector.shape_cast %57 : vector<1x8x8x128xbf16> to vector<8x8x128xbf16>
    %59 = vector.shape_cast %58 : vector<8x8x128xbf16> to vector<64x128xbf16>
    %c8 = arith.constant 8 : index
    %c0_60 = arith.constant 0 : index
    %c0_61 = arith.constant 0 : index
    %60 = vector.load %arg3[%c8, %c0_60, %c0_61] : memref<9x128x128xbf16, #tpu.memory_space<vmem>>, vector<1x128x128xbf16>
    %61 = vector.shape_cast %60 : vector<1x128x128xbf16> to vector<128x128xbf16>
    %cst_62 = arith.constant dense<0.000000e+00> : vector<64x128xf32>
    %62 = tpu.matmul %59, %61, %cst_62 {dimension_numbers = #tpu.dot_dimension_numbers<[1], [0], [0], [1], [0, 0, 1, 1], [], []>} : vector<64x128xbf16>, vector<128x128xbf16>, vector<64x128xf32> -> vector<64x128xf32>
    %63 = arith.addf %56, %62 : vector<64x128xf32>
    %c0_63 = arith.constant 0 : index
    %c0_64 = arith.constant 0 : index
    %64 = vector.load %arg4[%c0_63, %c0_64] : memref<1x128xf32, #tpu.memory_space<vmem>>, vector<1x128xf32>
    %65 = vector.broadcast %64 : vector<1x128xf32> to vector<64x128xf32>
    %66 = arith.mulf %63, %65 : vector<64x128xf32>
    %c0_65 = arith.constant 0 : index
    %c0_66 = arith.constant 0 : index
    %c0_67 = arith.constant 0 : index
    %c0_68 = arith.constant 0 : index
    %67 = vector.load %arg5[%c0_65, %c0_66, %c0_67, %c0_68] : memref<1x9x9x4xbf16, #tpu.memory_space<vmem>>, vector<1x8x8x4xbf16>
    %68 = vector.shape_cast %67 : vector<1x8x8x4xbf16> to vector<8x8x4xbf16>
    %69 = vector.shape_cast %68 : vector<8x8x4xbf16> to vector<64x4xbf16>
    %c0_69 = arith.constant 0 : index
    %c0_70 = arith.constant 0 : index
    %70 = vector.load %arg6[%c0_69, %c0_70] : memref<4x128xbf16, #tpu.memory_space<vmem>>, vector<4x128xbf16>
    %cst_71 = arith.constant dense<0.000000e+00> : vector<64x128xf32>
    %71 = tpu.matmul %69, %70, %cst_71 {dimension_numbers = #tpu.dot_dimension_numbers<[1], [0], [0], [1], [0, 0, 1, 1], [], []>} : vector<64x4xbf16>, vector<4x128xbf16>, vector<64x128xf32> -> vector<64x128xf32>
    %c0_72 = arith.constant 0 : index
    %c0_73 = arith.constant 0 : index
    %72 = vector.load %arg7[%c0_72, %c0_73] : memref<1x128xf32, #tpu.memory_space<vmem>>, vector<1x128xf32>
    %73 = vector.broadcast %72 : vector<1x128xf32> to vector<64x128xf32>
    %74 = arith.mulf %71, %73 : vector<64x128xf32>
    %75 = arith.addf %66, %74 : vector<64x128xf32>
    %c0_74 = arith.constant 0 : index
    %c0_75 = arith.constant 0 : index
    %76 = vector.load %arg8[%c0_74, %c0_75] : memref<1x128xf32, #tpu.memory_space<vmem>>, vector<1x128xf32>
    %77 = vector.broadcast %76 : vector<1x128xf32> to vector<64x128xf32>
    %78 = arith.addf %75, %77 : vector<64x128xf32>
    %cst_76 = arith.constant 0.000000e+00 : f32
    %79 = vector.broadcast %cst_76 : f32 to vector<64x128xf32>
    %80 = arith.maximumf %78, %79 : vector<64x128xf32>
    %c0_77 = arith.constant 0 : index
    %c0_78 = arith.constant 0 : index
    %c0_79 = arith.constant 0 : index
    %81 = vector.load %arg9[%c0_77, %c0_78, %c0_79] : memref<1x64x128xf32, #tpu.memory_space<vmem>>, vector<1x64x128xf32>
    %82 = vector.shape_cast %81 : vector<1x64x128xf32> to vector<64x128xf32>
    %83 = vector.shape_cast %80 : vector<64x128xf32> to vector<1x64x128xf32>
    tpu.vector_store %arg9[%c0_77, %c0_78, %c0_79], %83 {strides = array<i32>} : memref<1x64x128xf32, #tpu.memory_space<vmem>>, vector<1x64x128xf32>,
    return
  }
  func.func @transform_0(%arg0: i32, %arg1: i32) -> (i32, i32, i32, i32) {
    %c0_i32 = arith.constant 0 : i32
    %c0_i32_0 = arith.constant 0 : i32
    %c0_i32_1 = arith.constant 0 : i32
    %c0_i32_2 = arith.constant 0 : i32
    return %arg0, %c0_i32, %c0_i32_0, %c0_i32_1 : i32, i32, i32, i32
  }
  func.func @transform_1(%arg0: i32, %arg1: i32) -> (i32, i32, i32) {
    %c0_i32 = arith.constant 0 : i32
    %c0_i32_0 = arith.constant 0 : i32
    %c0_i32_1 = arith.constant 0 : i32
    return %c0_i32, %c0_i32_0, %arg1 : i32, i32, i32
  }
  func.func @transform_2(%arg0: i32, %arg1: i32) -> (i32, i32) {
    %c0_i32 = arith.constant 0 : i32
    %c0_i32_0 = arith.constant 0 : i32
    return %c0_i32, %arg1 : i32, i32
  }
  func.func @transform_3(%arg0: i32, %arg1: i32) -> (i32, i32, i32, i32) {
    %c0_i32 = arith.constant 0 : i32
    %c0_i32_0 = arith.constant 0 : i32
    %c0_i32_1 = arith.constant 0 : i32
    %c0_i32_2 = arith.constant 0 : i32
    return %arg0, %c0_i32, %c0_i32_0, %c0_i32_1 : i32, i32, i32, i32
  }
  func.func @transform_4(%arg0: i32, %arg1: i32) -> (i32, i32) {
    %c0_i32 = arith.constant 0 : i32
    %c0_i32_0 = arith.constant 0 : i32
    return %c0_i32, %arg1 : i32, i32
  }
  func.func @transform_5(%arg0: i32, %arg1: i32) -> (i32, i32) {
    %c0_i32 = arith.constant 0 : i32
    %c0_i32_0 = arith.constant 0 : i32
    return %c0_i32, %arg1 : i32, i32
  }
  func.func @transform_6(%arg0: i32, %arg1: i32) -> (i32, i32) {
    %c0_i32 = arith.constant 0 : i32
    %c0_i32_0 = arith.constant 0 : i32
    return %c0_i32, %arg1 : i32, i32
  }
  func.func @transform_7(%arg0: i32, %arg1: i32) -> (i32, i32, i32) {
    %c0_i32 = arith.constant 0 : i32
    %c0_i32_0 = arith.constant 0 : i32
    return %arg0, %c0_i32, %arg1 : i32, i32, i32
  }
}

module attributes {stable_mosaic.version = 11 : i64} {
  func.func @_conv1_kernel(%arg0: i32, %arg1: i32, %arg2: memref<1x9x9x4xbf16, #tpu.memory_space<vmem>>, %arg3: memref<1x9x9x4xbf16, #tpu.memory_space<vmem>>, %arg4: memref<1x9x9x4xbf16, #tpu.memory_space<vmem>>, %arg5: memref<1x9x9x4xbf16, #tpu.memory_space<vmem>>, %arg6: memref<9x4x128xbf16, #tpu.memory_space<vmem>>, %arg7: memref<1x128xf32, #tpu.memory_space<vmem>>, %arg8: memref<1x128xf32, #tpu.memory_space<vmem>>, %arg9: memref<1x64x128xbf16, #tpu.memory_space<vmem>>) attributes {dimension_semantics = [#tpu.dimension_semantics<parallel>, #tpu.dimension_semantics<parallel>], iteration_bounds = array<i64: 2, 1>, scalar_prefetch = 0 : i64, scratch_operands = 0 : i64, tpu.core_type = #tpu.core_type<tc>, window_params = [{transform_indices = @transform_0, window_bounds = array<i64: 1, 9, 9, 4>}, {transform_indices = @transform_1, window_bounds = array<i64: 1, 9, 9, 4>}, {transform_indices = @transform_2, window_bounds = array<i64: 1, 9, 9, 4>}, {transform_indices = @transform_3, window_bounds = array<i64: 1, 9, 9, 4>}, {transform_indices = @transform_4, window_bounds = array<i64: 9, 4, 128>}, {transform_indices = @transform_5, window_bounds = array<i64: 1, 128>}, {transform_indices = @transform_6, window_bounds = array<i64: 1, 128>}, {transform_indices = @transform_7, window_bounds = array<i64: 1, 64, 128>}]} {
    %cst = arith.constant 0.000000e+00 : f32
    %0 = vector.broadcast %cst : f32 to vector<64x128xf32>
    %c0 = arith.constant 0 : index
    %c0_0 = arith.constant 0 : index
    %c0_1 = arith.constant 0 : index
    %c0_2 = arith.constant 0 : index
    %1 = vector.load %arg2[%c0, %c0_0, %c0_1, %c0_2] : memref<1x9x9x4xbf16, #tpu.memory_space<vmem>>, vector<1x8x8x4xbf16>
    %2 = vector.shape_cast %1 : vector<1x8x8x4xbf16> to vector<8x8x4xbf16>
    %3 = vector.shape_cast %2 : vector<8x8x4xbf16> to vector<64x4xbf16>
    %c0_3 = arith.constant 0 : index
    %c0_4 = arith.constant 0 : index
    %c0_5 = arith.constant 0 : index
    %4 = vector.load %arg6[%c0_3, %c0_4, %c0_5] : memref<9x4x128xbf16, #tpu.memory_space<vmem>>, vector<1x4x128xbf16>
    %5 = vector.shape_cast %4 : vector<1x4x128xbf16> to vector<4x128xbf16>
    %cst_6 = arith.constant dense<0.000000e+00> : vector<64x128xf32>
    %6 = tpu.matmul %3, %5, %cst_6 {dimension_numbers = #tpu.dot_dimension_numbers<[1], [0], [0], [1], [0, 0, 1, 1], [], []>} : vector<64x4xbf16>, vector<4x128xbf16>, vector<64x128xf32> -> vector<64x128xf32>
    %7 = arith.addf %0, %6 : vector<64x128xf32>
    %c0_7 = arith.constant 0 : index
    %c0_8 = arith.constant 0 : index
    %c0_9 = arith.constant 0 : index
    %c0_10 = arith.constant 0 : index
    %8 = vector.load %arg3[%c0_7, %c0_8, %c0_9, %c0_10] : memref<1x9x9x4xbf16, #tpu.memory_space<vmem>>, vector<1x8x8x4xbf16>
    %9 = vector.shape_cast %8 : vector<1x8x8x4xbf16> to vector<8x8x4xbf16>
    %10 = vector.shape_cast %9 : vector<8x8x4xbf16> to vector<64x4xbf16>
    %c1 = arith.constant 1 : index
    %c0_11 = arith.constant 0 : index
    %c0_12 = arith.constant 0 : index
    %11 = vector.load %arg6[%c1, %c0_11, %c0_12] : memref<9x4x128xbf16, #tpu.memory_space<vmem>>, vector<1x4x128xbf16>
    %12 = vector.shape_cast %11 : vector<1x4x128xbf16> to vector<4x128xbf16>
    %cst_13 = arith.constant dense<0.000000e+00> : vector<64x128xf32>
    %13 = tpu.matmul %10, %12, %cst_13 {dimension_numbers = #tpu.dot_dimension_numbers<[1], [0], [0], [1], [0, 0, 1, 1], [], []>} : vector<64x4xbf16>, vector<4x128xbf16>, vector<64x128xf32> -> vector<64x128xf32>
    %14 = arith.addf %7, %13 : vector<64x128xf32>
    %c0_14 = arith.constant 0 : index
    %c0_15 = arith.constant 0 : index
    %c1_16 = arith.constant 1 : index
    %c0_17 = arith.constant 0 : index
    %15 = vector.load %arg2[%c0_14, %c0_15, %c1_16, %c0_17] : memref<1x9x9x4xbf16, #tpu.memory_space<vmem>>, vector<1x8x8x4xbf16>
    %16 = vector.shape_cast %15 : vector<1x8x8x4xbf16> to vector<8x8x4xbf16>
    %17 = vector.shape_cast %16 : vector<8x8x4xbf16> to vector<64x4xbf16>
    %c2 = arith.constant 2 : index
    %c0_18 = arith.constant 0 : index
    %c0_19 = arith.constant 0 : index
    %18 = vector.load %arg6[%c2, %c0_18, %c0_19] : memref<9x4x128xbf16, #tpu.memory_space<vmem>>, vector<1x4x128xbf16>
    %19 = vector.shape_cast %18 : vector<1x4x128xbf16> to vector<4x128xbf16>
    %cst_20 = arith.constant dense<0.000000e+00> : vector<64x128xf32>
    %20 = tpu.matmul %17, %19, %cst_20 {dimension_numbers = #tpu.dot_dimension_numbers<[1], [0], [0], [1], [0, 0, 1, 1], [], []>} : vector<64x4xbf16>, vector<4x128xbf16>, vector<64x128xf32> -> vector<64x128xf32>
    %21 = arith.addf %14, %20 : vector<64x128xf32>
    %c0_21 = arith.constant 0 : index
    %c0_22 = arith.constant 0 : index
    %c0_23 = arith.constant 0 : index
    %c0_24 = arith.constant 0 : index
    %22 = vector.load %arg4[%c0_21, %c0_22, %c0_23, %c0_24] : memref<1x9x9x4xbf16, #tpu.memory_space<vmem>>, vector<1x8x8x4xbf16>
    %23 = vector.shape_cast %22 : vector<1x8x8x4xbf16> to vector<8x8x4xbf16>
    %24 = vector.shape_cast %23 : vector<8x8x4xbf16> to vector<64x4xbf16>
    %c3 = arith.constant 3 : index
    %c0_25 = arith.constant 0 : index
    %c0_26 = arith.constant 0 : index
    %25 = vector.load %arg6[%c3, %c0_25, %c0_26] : memref<9x4x128xbf16, #tpu.memory_space<vmem>>, vector<1x4x128xbf16>
    %26 = vector.shape_cast %25 : vector<1x4x128xbf16> to vector<4x128xbf16>
    %cst_27 = arith.constant dense<0.000000e+00> : vector<64x128xf32>
    %27 = tpu.matmul %24, %26, %cst_27 {dimension_numbers = #tpu.dot_dimension_numbers<[1], [0], [0], [1], [0, 0, 1, 1], [], []>} : vector<64x4xbf16>, vector<4x128xbf16>, vector<64x128xf32> -> vector<64x128xf32>
    %28 = arith.addf %21, %27 : vector<64x128xf32>
    %c0_28 = arith.constant 0 : index
    %c0_29 = arith.constant 0 : index
    %c0_30 = arith.constant 0 : index
    %c0_31 = arith.constant 0 : index
    %29 = vector.load %arg5[%c0_28, %c0_29, %c0_30, %c0_31] : memref<1x9x9x4xbf16, #tpu.memory_space<vmem>>, vector<1x8x8x4xbf16>
    %30 = vector.shape_cast %29 : vector<1x8x8x4xbf16> to vector<8x8x4xbf16>
    %31 = vector.shape_cast %30 : vector<8x8x4xbf16> to vector<64x4xbf16>
    %c4 = arith.constant 4 : index
    %c0_32 = arith.constant 0 : index
    %c0_33 = arith.constant 0 : index
    %32 = vector.load %arg6[%c4, %c0_32, %c0_33] : memref<9x4x128xbf16, #tpu.memory_space<vmem>>, vector<1x4x128xbf16>
    %33 = vector.shape_cast %32 : vector<1x4x128xbf16> to vector<4x128xbf16>
    %cst_34 = arith.constant dense<0.000000e+00> : vector<64x128xf32>
    %34 = tpu.matmul %31, %33, %cst_34 {dimension_numbers = #tpu.dot_dimension_numbers<[1], [0], [0], [1], [0, 0, 1, 1], [], []>} : vector<64x4xbf16>, vector<4x128xbf16>, vector<64x128xf32> -> vector<64x128xf32>
    %35 = arith.addf %28, %34 : vector<64x128xf32>
    %c0_35 = arith.constant 0 : index
    %c0_36 = arith.constant 0 : index
    %c1_37 = arith.constant 1 : index
    %c0_38 = arith.constant 0 : index
    %36 = vector.load %arg4[%c0_35, %c0_36, %c1_37, %c0_38] : memref<1x9x9x4xbf16, #tpu.memory_space<vmem>>, vector<1x8x8x4xbf16>
    %37 = vector.shape_cast %36 : vector<1x8x8x4xbf16> to vector<8x8x4xbf16>
    %38 = vector.shape_cast %37 : vector<8x8x4xbf16> to vector<64x4xbf16>
    %c5 = arith.constant 5 : index
    %c0_39 = arith.constant 0 : index
    %c0_40 = arith.constant 0 : index
    %39 = vector.load %arg6[%c5, %c0_39, %c0_40] : memref<9x4x128xbf16, #tpu.memory_space<vmem>>, vector<1x4x128xbf16>
    %40 = vector.shape_cast %39 : vector<1x4x128xbf16> to vector<4x128xbf16>
    %cst_41 = arith.constant dense<0.000000e+00> : vector<64x128xf32>
    %41 = tpu.matmul %38, %40, %cst_41 {dimension_numbers = #tpu.dot_dimension_numbers<[1], [0], [0], [1], [0, 0, 1, 1], [], []>} : vector<64x4xbf16>, vector<4x128xbf16>, vector<64x128xf32> -> vector<64x128xf32>
    %42 = arith.addf %35, %41 : vector<64x128xf32>
    %c0_42 = arith.constant 0 : index
    %c1_43 = arith.constant 1 : index
    %c0_44 = arith.constant 0 : index
    %c0_45 = arith.constant 0 : index
    %43 = vector.load %arg2[%c0_42, %c1_43, %c0_44, %c0_45] : memref<1x9x9x4xbf16, #tpu.memory_space<vmem>>, vector<1x8x8x4xbf16>
    %44 = vector.shape_cast %43 : vector<1x8x8x4xbf16> to vector<8x8x4xbf16>
    %45 = vector.shape_cast %44 : vector<8x8x4xbf16> to vector<64x4xbf16>
    %c6 = arith.constant 6 : index
    %c0_46 = arith.constant 0 : index
    %c0_47 = arith.constant 0 : index
    %46 = vector.load %arg6[%c6, %c0_46, %c0_47] : memref<9x4x128xbf16, #tpu.memory_space<vmem>>, vector<1x4x128xbf16>
    %47 = vector.shape_cast %46 : vector<1x4x128xbf16> to vector<4x128xbf16>
    %cst_48 = arith.constant dense<0.000000e+00> : vector<64x128xf32>
    %48 = tpu.matmul %45, %47, %cst_48 {dimension_numbers = #tpu.dot_dimension_numbers<[1], [0], [0], [1], [0, 0, 1, 1], [], []>} : vector<64x4xbf16>, vector<4x128xbf16>, vector<64x128xf32> -> vector<64x128xf32>
    %49 = arith.addf %42, %48 : vector<64x128xf32>
    %c0_49 = arith.constant 0 : index
    %c1_50 = arith.constant 1 : index
    %c0_51 = arith.constant 0 : index
    %c0_52 = arith.constant 0 : index
    %50 = vector.load %arg3[%c0_49, %c1_50, %c0_51, %c0_52] : memref<1x9x9x4xbf16, #tpu.memory_space<vmem>>, vector<1x8x8x4xbf16>
    %51 = vector.shape_cast %50 : vector<1x8x8x4xbf16> to vector<8x8x4xbf16>
    %52 = vector.shape_cast %51 : vector<8x8x4xbf16> to vector<64x4xbf16>
    %c7 = arith.constant 7 : index
    %c0_53 = arith.constant 0 : index
    %c0_54 = arith.constant 0 : index
    %53 = vector.load %arg6[%c7, %c0_53, %c0_54] : memref<9x4x128xbf16, #tpu.memory_space<vmem>>, vector<1x4x128xbf16>
    %54 = vector.shape_cast %53 : vector<1x4x128xbf16> to vector<4x128xbf16>
    %cst_55 = arith.constant dense<0.000000e+00> : vector<64x128xf32>
    %55 = tpu.matmul %52, %54, %cst_55 {dimension_numbers = #tpu.dot_dimension_numbers<[1], [0], [0], [1], [0, 0, 1, 1], [], []>} : vector<64x4xbf16>, vector<4x128xbf16>, vector<64x128xf32> -> vector<64x128xf32>
    %56 = arith.addf %49, %55 : vector<64x128xf32>
    %c0_56 = arith.constant 0 : index
    %c1_57 = arith.constant 1 : index
    %c1_58 = arith.constant 1 : index
    %c0_59 = arith.constant 0 : index
    %57 = vector.load %arg2[%c0_56, %c1_57, %c1_58, %c0_59] : memref<1x9x9x4xbf16, #tpu.memory_space<vmem>>, vector<1x8x8x4xbf16>
    %58 = vector.shape_cast %57 : vector<1x8x8x4xbf16> to vector<8x8x4xbf16>
    %59 = vector.shape_cast %58 : vector<8x8x4xbf16> to vector<64x4xbf16>
    %c8 = arith.constant 8 : index
    %c0_60 = arith.constant 0 : index
    %c0_61 = arith.constant 0 : index
    %60 = vector.load %arg6[%c8, %c0_60, %c0_61] : memref<9x4x128xbf16, #tpu.memory_space<vmem>>, vector<1x4x128xbf16>
    %61 = vector.shape_cast %60 : vector<1x4x128xbf16> to vector<4x128xbf16>
    %cst_62 = arith.constant dense<0.000000e+00> : vector<64x128xf32>
    %62 = tpu.matmul %59, %61, %cst_62 {dimension_numbers = #tpu.dot_dimension_numbers<[1], [0], [0], [1], [0, 0, 1, 1], [], []>} : vector<64x4xbf16>, vector<4x128xbf16>, vector<64x128xf32> -> vector<64x128xf32>
    %63 = arith.addf %56, %62 : vector<64x128xf32>
    %c0_63 = arith.constant 0 : index
    %c0_64 = arith.constant 0 : index
    %64 = vector.load %arg7[%c0_63, %c0_64] : memref<1x128xf32, #tpu.memory_space<vmem>>, vector<1x128xf32>
    %65 = vector.broadcast %64 : vector<1x128xf32> to vector<64x128xf32>
    %66 = arith.mulf %63, %65 : vector<64x128xf32>
    %c0_65 = arith.constant 0 : index
    %c0_66 = arith.constant 0 : index
    %67 = vector.load %arg8[%c0_65, %c0_66] : memref<1x128xf32, #tpu.memory_space<vmem>>, vector<1x128xf32>
    %68 = vector.broadcast %67 : vector<1x128xf32> to vector<64x128xf32>
    %69 = arith.addf %66, %68 : vector<64x128xf32>
    %cst_67 = arith.constant 0.000000e+00 : f32
    %cst_68 = arith.constant 1.000000e+00 : f32
    %70 = vector.broadcast %cst_67 : f32 to vector<64x128xf32>
    %71 = arith.maximumf %70, %69 : vector<64x128xf32>
    %72 = vector.broadcast %cst_68 : f32 to vector<64x128xf32>
    %73 = arith.minimumf %72, %71 : vector<64x128xf32>
    %cst_69 = arith.constant 1.500000e+01 : f32
    %74 = vector.broadcast %cst_69 : f32 to vector<64x128xf32>
    %75 = arith.mulf %73, %74 : vector<64x128xf32>
    %76 = math.roundeven %75 : vector<64x128xf32>
    %77 = arith.truncf %76 : vector<64x128xf32> to vector<64x128xbf16>
    %c0_70 = arith.constant 0 : index
    %c0_71 = arith.constant 0 : index
    %c0_72 = arith.constant 0 : index
    %78 = vector.load %arg9[%c0_70, %c0_71, %c0_72] : memref<1x64x128xbf16, #tpu.memory_space<vmem>>, vector<1x64x128xbf16>
    %79 = vector.shape_cast %78 : vector<1x64x128xbf16> to vector<64x128xbf16>
    %80 = vector.shape_cast %77 : vector<64x128xbf16> to vector<1x64x128xbf16>
    tpu.vector_store %arg9[%c0_70, %c0_71, %c0_72], %80 {strides = array<i32>} : memref<1x64x128xbf16, #tpu.memory_space<vmem>>, vector<1x64x128xbf16>,
    return
  }
  func.func @transform_0(%arg0: i32, %arg1: i32) -> (i32, i32, i32, i32) {
    %c0_i32 = arith.constant 0 : i32
    %c0_i32_0 = arith.constant 0 : i32
    %c0_i32_1 = arith.constant 0 : i32
    %c0_i32_2 = arith.constant 0 : i32
    return %arg0, %c0_i32, %c0_i32_0, %c0_i32_1 : i32, i32, i32, i32
  }
  func.func @transform_1(%arg0: i32, %arg1: i32) -> (i32, i32, i32, i32) {
    %c0_i32 = arith.constant 0 : i32
    %c0_i32_0 = arith.constant 0 : i32
    %c0_i32_1 = arith.constant 0 : i32
    %c0_i32_2 = arith.constant 0 : i32
    return %arg0, %c0_i32, %c0_i32_0, %c0_i32_1 : i32, i32, i32, i32
  }
  func.func @transform_2(%arg0: i32, %arg1: i32) -> (i32, i32, i32, i32) {
    %c0_i32 = arith.constant 0 : i32
    %c0_i32_0 = arith.constant 0 : i32
    %c0_i32_1 = arith.constant 0 : i32
    %c0_i32_2 = arith.constant 0 : i32
    return %arg0, %c0_i32, %c0_i32_0, %c0_i32_1 : i32, i32, i32, i32
  }
  func.func @transform_3(%arg0: i32, %arg1: i32) -> (i32, i32, i32, i32) {
    %c0_i32 = arith.constant 0 : i32
    %c0_i32_0 = arith.constant 0 : i32
    %c0_i32_1 = arith.constant 0 : i32
    %c0_i32_2 = arith.constant 0 : i32
    return %arg0, %c0_i32, %c0_i32_0, %c0_i32_1 : i32, i32, i32, i32
  }
  func.func @transform_4(%arg0: i32, %arg1: i32) -> (i32, i32, i32) {
    %c0_i32 = arith.constant 0 : i32
    %c0_i32_0 = arith.constant 0 : i32
    %c0_i32_1 = arith.constant 0 : i32
    return %c0_i32, %c0_i32_0, %arg1 : i32, i32, i32
  }
  func.func @transform_5(%arg0: i32, %arg1: i32) -> (i32, i32) {
    %c0_i32 = arith.constant 0 : i32
    %c0_i32_0 = arith.constant 0 : i32
    return %c0_i32, %arg1 : i32, i32
  }
  func.func @transform_6(%arg0: i32, %arg1: i32) -> (i32, i32) {
    %c0_i32 = arith.constant 0 : i32
    %c0_i32_0 = arith.constant 0 : i32
    return %c0_i32, %arg1 : i32, i32
  }
  func.func @transform_7(%arg0: i32, %arg1: i32) -> (i32, i32, i32) {
    %c0_i32 = arith.constant 0 : i32
    %c0_i32_0 = arith.constant 0 : i32
    return %arg0, %c0_i32, %arg1 : i32, i32, i32
  }
}

</mosaic_0001>

<bundles_post_ra>
// kernel: basic_block_forward.2
= control target key start
LH: loop header
LB: loop body
LE: loop exit
PB: predicated region body
PF: predicated region fallthrough
CT: control target
= control target key end

     0   :  { %s2550_s24 = smov 0   ;;  %s2552_s25 = smov 0   ;;  %s2857_s0 = inlined_call_operand.vmem [shape: bf16[2,9,9,4], index: 0, kind: input, shape index: {}]   ;;  %s2858_s1 = inlined_call_operand.vmem [shape: bf16[2,9,9,4], index: 1, kind: input, shape index: {}]   ;;  %s2859_s2 = inlined_call_operand.vmem [shape: bf16[2,9,9,4], index: 2, kind: input, shape index: {}]   ;;  %s2860_s3 = inlined_call_operand.vmem [shape: bf16[2,9,9,4], index: 3, kind: input, shape index: {}]   ;;  %s2861_s4 = inlined_call_operand.vmem [shape: bf16[9,4,128], index: 4, kind: input, shape index: {}]   ;;  %s2862_s5 = inlined_call_operand.vmem [shape: f32[1,128], index: 5, kind: input, shape index: {}]   ;;  %s2863_s6 = inlined_call_operand.vmem [shape: f32[1,128], index: 6, kind: input, shape index: {}]   ;;  %s2864_s7 = inlined_call_operand.vmem [shape: bf16[2,64,128], index: 7, kind: output, shape index: {}]  }
   0x1   :  { %s2554_s26 = smov 0  }
   0x2 LB: > { %s29_s27 = sadd.s32 1, %s2504_s25  ;;  %p2055_p0 = scmp.ge.s32.totalorder %s2508_s26, 1  ;;  %s2508_s26 = sphi %s2554_s26, %s17_s26   ;;  %s2504_s25 = sphi %s2552_s25, %s2868_s25   ;;  %s2500_s24 = sphi %s2550_s24, %s2867_s24  }
   0x3   : > { %p31_p1 = scmp.ge.s32.totalorder %s29_s27, 2  ;;  %p306_p2 = scmp.lt.s32.totalorder %s2508_s26, 3 }
   0x5   : > { %s2870_s27 = smov (%p31_p1, %s29_s27), 0  ;;  %p307_p3 = pnand %p2055_p0, %p306_p2 }
   0x6   : > { %v2062_v0 = vld [vmem:[%s2861_s4 + $0x2] sm:$0x3] (!%p307_p3)  ;;  %vm457_vm0 = vcmask (!%p307_p3), 1041408   ;;  %v2574_v1 = vld [vmem:[%s2861_s4 + $0x8] sm:$0x3] (!%p307_p3)  ;;  %p366_p4 = scmp.lt.s32.totalorder (!%p307_p3), %s2500_s24, 1 }
   0x7   : > { %310 = sbr.rel (%p307_p3) target bundleno = 327 (0x147), region = 48  ;;  %2419 = vmatprep.subr.msk.bf16.mxu1 (!%p307_p3), %vm457_vm0, %v2062_v0  ;;  %2423 = vmatprep.subr.msk.bf16.mxu0 (!%p307_p3), %vm457_vm0, %v2574_v1  ;;  %v459_v2 = vsel (!%p307_p3), %vm457_vm0, %v2062_v0, 0  ;;  %v2582_v3 = vsel (!%p307_p3), %vm457_vm0, %v2574_v1, 0  ;;  %v413_v4 = vld [vmem:[%s2861_s4] sm:$0x3] (!%p307_p3)  ;;  %vm444_vm1 = vcmask (!%p307_p3), 31744  }
   0x8   : > { %2264 = vmatpush3.bf16.msra.mxu1 (!%p307_p3), %v459_v2  ;;  %2304 = vmatpush3.bf16.msra.mxu0 (!%p307_p3), %v2582_v3  ;;  %v2106_v5 = vld [vmem:[%s2861_s4 + $0xa] sm:$0x3] (!%p307_p3)  ;;  %v559_v6 = vsel (!%p307_p3), %vm457_vm0, %v413_v4, 0  ;;  %v2123_v9 = vld [vmem:[%s2861_s4 + $0xc] sm:$0x3] (!%p307_p3) }
   0x9   : > { %2420 = vmatprep.subr.msk.bf16.mxu1 (!%p307_p3), %vm457_vm0, %v413_v4  ;;  %2425 = vmatprep.subr.msk.bf16.mxu0 (!%p307_p3), %vm457_vm0, %v2106_v5  ;;  %v1250_v7 = vsel (!%p307_p3), %vm457_vm0, %v2106_v5, 0  ;;  %v2079_v10 = vld [vmem:[%s2861_s4 + $0x4] sm:$0x3] (!%p307_p3)  ;;  %vm642_vm2 = vsmask.f32 (!%p307_p3), 3328  ;;  %v2634_v15 = vsel (!%p307_p3), %vm457_vm0, %v2123_v9, 0 }
   0xa   : > { %vm643_vm3 = vsmask.f32 (!%p307_p3), 7440  ;;  %v2637_v16 = vsel (!%p307_p3), %vm457_vm0, %v2079_v10, 0  ;;  %v2175_v44 = vld [vmem:[%s2863_s6] ss:$0 sm:$0xff] (!%p307_p3) }
   0xb   : > { %vm2660_vm4 = vmor (!%p307_p3), %vm642_vm2, %vm643_vm3 }
   0xe   : > { %s2872_s24 = smov (!%p366_p4, %s2500_s24), 1 }
   0xf   : > { %s2596_s13 = smul.u32 72, %s2872_s24 }
  0x11   : > { %s2602_s16 = scalar_lea.vmem %s2858_s1, %s2596_s13  ;;  %s2611_s19 = scalar_lea.vmem %s2860_s3, %s2596_s13 }
  0x12   : > { %v2462_v8 = vld [vmem:[%s2602_s16] ss:$8 sps:$4 sm:$0xff]   ;;  %v2464_v12 = vld [vmem:[%s2602_s16 + $0x10] ss:$8 sps:$4 sm:$0xff]   ;;  %s2626_s30 = scalar_lea.vmem %s2859_s2, %s2596_s13  ;;  %s2654_s10 = scalar_lea.vmem %s2857_s0, %s2596_s13 }
  0x13   : > { %v2463_v11 = vld [vmem:[%s2611_s19] ss:$8 sps:$4 sm:$0xff]   ;;  %2265 = vmatprep.mubr.msk.bf16.mxu1 %vm444_vm1, %v2462_v8  ;;  %v2465_v13 = vld [vmem:[%s2611_s19 + $0x10] ss:$8 sps:$4 sm:$0xff]   ;;  %v1096_v19 = vld [vmem:[%s2626_s30 + $0x4] sm:$0x1] }
  0x14   : > { %2305 = vmatprep.mubr.msk.bf16.mxu0 %vm444_vm1, %v2463_v11  ;;  %2266 = vmatmul.mubr.msk.bf16.vlgmr.msra.gmra.mrb[0].mxu1 %vm444_vm1, %v2464_v12  ;;  %v2466_v14 = vld [vmem:[%s2602_s16 + $0x20] ss:$8 sps:$4 sm:$0xff]   ;;  %v2467_v17 = vld [vmem:[%s2602_s16 + $0x30] ss:$8 sps:$4 sm:$0xff]   ;;  %v1098_v21 = vld [vmem:[%s2626_s30 + $0xc] sm:$0x1] }
  0x15   : > { %2274 = vmatpush3.bf16.msra.mxu1 %v559_v6  ;;  %2306 = vmatmul.mubr.msk.bf16.vlgmr.msra.gmra.mrb[0].mxu0 %vm444_vm1, %v2465_v13  ;;  %v1095_v18 = vld [vmem:[%s2626_s30] sm:$0xf]  ;;  %v1097_v20 = vld [vmem:[%s2626_s30 + $0x8] sm:$0xf]  ;;  %v1121_v24 = vshll.u32 %v1096_v19, 16  ;;  %v1135_v27 = vshll.u32 %v1098_v21, 16 }
  0x16   : > { %2314 = vmatpush3.bf16.msra.mxu0 %v1250_v7  ;;  %2269 = vmatprep.mubr.msk.bf16.mxu1 %vm444_vm1, %v2466_v14  ;;  %v1112_v22 = vshrl.u32 %v1095_v18, 16  ;;  %v1115_v23 = vshll.u32 %v1095_v18, 16  ;;  %v1126_v25 = vshrl.u32 %v1097_v20, 16  ;;  %v1129_v26 = vshll.u32 %v1097_v20, 16  ;;  %v1099_v28 = vld [vmem:[%s2626_s30 + $0x10] sm:$0xf] }
  0x17   : > { %2426 = vmatprep.subr.msk.bf16.mxu0 %vm457_vm0, %v2123_v9  ;;  %2421 = vmatprep.subr.msk.bf16.mxu1 %vm457_vm0, %v2079_v10  ;;  %v1100_v29 = vld [vmem:[%s2626_s30 + $0x14] sm:$0x1]  ;;  %v1123_v32 = vrot.slane %v1121_v24, 5  ;;  %v1101_v34 = vld [vmem:[%s2626_s30 + $0x18] sm:$0xf]  ;;  %v1137_v36 = vrot.slane %v1135_v27, 5 }
  0x18   : > { %v1114_v30 = vrot.slane %v1112_v22, 4  ;;  %v1117_v31 = vrot.slane %v1115_v23, 5  ;;  %v1128_v33 = vrot.slane %v1126_v25, 4  ;;  %v1131_v35 = vrot.slane %v1129_v26, 5  ;;  %v1102_v37 = vld [vmem:[%s2626_s30 + $0x1c] sm:$0x1] }
  0x19   : > { %v1140_v38 = vshrl.u32 %v1099_v28, 16  ;;  %v1143_v39 = vshll.u32 %v1099_v28, 16  ;;  %v1149_v41 = vshll.u32 %v1100_v29, 16  ;;  %v1154_v42 = vshrl.u32 %v1101_v34, 16  ;;  %v2468_v53 = vld [vmem:[%s2654_s10] ss:$8 sps:$4 sm:$0xff]  }
  0x1a   : > { %v1118_v40 = vor.u32 %v1117_v31, %v1114_v30  ;;  %v1157_v43 = vshll.u32 %v1101_v34, 16  ;;  %v1132_v45 = vor.u32 %v1131_v35, %v1128_v33  ;;  %v1163_v48 = vshll.u32 %v1102_v37, 16  ;;  %v2469_v59 = vld [vmem:[%s2654_s10 + $0x10] ss:$8 sps:$4 sm:$0xff]   ;;  %v1103_v60 = vld [vmem:[%s2626_s30 + $0x20] sm:$0xf] }
  0x1b   : > { %v1142_v46 = vrot.slane %v1140_v38, 4  ;;  %v1145_v47 = vrot.slane %v1143_v39, 5  ;;  %v1151_v50 = vrot.slane %v1149_v41, 5  ;;  %v1156_v51 = vrot.slane %v1154_v42, 4  ;;  %v1104_v61 = vld [vmem:[%s2626_s30 + $0x24] sm:$0x1] }
  0x1c   : > { %2270 = vmatmul.mubr.msk.bf16.gmra.mrb[4].mxu1 %vm444_vm1, %v2467_v17  ;;  %v1119_v49 = vrot.slane %v1118_v40, 4  ;;  %v1159_v52 = vrot.slane %v1157_v43, 5  ;;  %v1133_v54 = vrot.slane %v1132_v45, 4  ;;  %v1165_v56 = vrot.slane %v1163_v48, 5  ;;  %v1105_v0 = vld [vmem:[%s2626_s30 + $0x28] sm:$0xf] }
  0x1d   : > { %v1146_v55 = vor.u32 %v1145_v47, %v1142_v46  ;;  %2275 = vmatprep.mubr.msk.bf16.mxu1 %vm444_vm1, %v2468_v53  ;;  %v1106_v2 = vld [vmem:[%s2626_s30 + $0x2c] sm:$0x1]  ;;  %v1168_v4 = vshrl.u32 %v1103_v60, 16  ;;  %v1171_v7 = vshll.u32 %v1103_v60, 16  ;;  %v1177_v8 = vshll.u32 %v1104_v61, 16 }
  0x1e   : > { %v1124_v57 = vsel %vm2660_vm4, %v1119_v49, %v1123_v32  ;;  %v1160_v58 = vor.u32 %v1159_v52, %v1156_v51  ;;  %v1138_v62 = vsel %vm2660_vm4, %v1133_v54, %v1137_v36  ;;  %v1107_v9 = vld [vmem:[%s2626_s30 + $0x30] sm:$0xf]  ;;  %v2679_v10 = vld [vmem:[%s2861_s4 + $0x6] sm:$0x3]  ;;  %v1182_v13 = vshrl.u32 %v1105_v0, 16 }
  0x1f   : > { %v1147_v63 = vrot.slane %v1146_v55, 4  ;;  %v2107_v5 = vcombine.low %v1124_v57, %v1138_v62  ;;  %v1170_v12 = vrot.slane %v1168_v4, 4  ;;  %v1185_v14 = vshll.u32 %v1105_v0, 16  ;;  %v1108_v17 = vld [vmem:[%s2626_s30 + $0x34] sm:$0x1] }
  0x20   : > { %v1161_v6 = vrot.slane %v1160_v58, 4  ;;  %v1173_v19 = vrot.slane %v1171_v7, 5  ;;  %v1179_v20 = vrot.slane %v1177_v8, 5  ;;  %v1191_v21 = vshll.u32 %v1106_v2, 16  ;;  %v1109_v22 = vld [vmem:[%s2626_s30 + $0x38] sm:$0xf] }
  0x21   : > { %v1152_v11 = vsel %vm2660_vm4, %v1147_v63, %v1151_v50  ;;  %2315 = vmatprep.mubr.msk.bf16.mxu0 %vm444_vm1, %v2107_v5  ;;  %v2691_v23 = vld [vmem:[%s2861_s4 + $0xe] sm:$0x3]  ;;  %v1184_v25 = vrot.slane %v1182_v13, 4  ;;  %v1187_v26 = vrot.slane %v1185_v14, 5  ;;  %v1110_v27 = vld [vmem:[%s2626_s30 + $0x3c] sm:$0x1] }
  0x22   : > { %v1166_v18 = vsel %vm2660_vm4, %v1161_v6, %v1165_v56  ;;  %v1196_v28 = vshrl.u32 %v1107_v9, 16  ;;  %v1174_v29 = vor.u32 %v1173_v19, %v1170_v12  ;;  %v1193_v30 = vrot.slane %v1191_v21, 5  ;;  %v2472_v53 = vld [vmem:[%s2654_s10 + $0x8] ss:$8 sps:$4 sm:$0xff]   ;;  %v626_v54 = vld [vmem:[%s2654_s10] sm:$0xf] }
  0x23   : > { %v2108_v24 = vcombine.low %v1152_v11, %v1166_v18  ;;  %v1199_v31 = vshll.u32 %v1107_v9, 16  ;;  %v1205_v32 = vshll.u32 %v1108_v17, 16  ;;  %v1188_v33 = vor.u32 %v1187_v26, %v1184_v25  ;;  %v627_v56 = vld [vmem:[%s2654_s10 + $0x4] sm:$0x1]  ;;  %v628_v57 = vld [vmem:[%s2654_s10 + $0x8] sm:$0xf] }
  0x24   : > { %2276 = vmatmul.mubr.msk.bf16.vlgmr.msra.gmra.mrb[0].mxu1 %vm444_vm1, %v2469_v59  ;;  %v1198_v34 = vrot.slane %v1196_v28, 4  ;;  %v1210_v35 = vshrl.u32 %v1109_v22, 16  ;;  %v1213_v36 = vshll.u32 %v1109_v22, 16  ;;  %v1175_v37 = vrot.slane %v1174_v29, 4  ;;  %v629_v58 = vld [vmem:[%s2654_s10 + $0xc] sm:$0x1] }
  0x25   : > { %2284 = vmatpush3.bf16.msra.mxu1 %v2637_v16  ;;  %2316 = vmatmul.mubr.msk.bf16.vlgmr.msra.gmra.mrb[0].mxu0 %vm444_vm1, %v2108_v24  ;;  %v1201_v38 = vrot.slane %v1199_v31, 5  ;;  %v1219_v39 = vshll.u32 %v1110_v27, 16  ;;  %v2470_v16 = vld [vmem:[%s2654_s10 + $0x20] ss:$8 sps:$4 sm:$0xff]   ;;  %v1189_v40 = vrot.slane %v1188_v33, 4  ;;  %v1207_v46 = vrot.slane %v1205_v32, 5 }
  0x26   : > { %2422 = vmatprep.subr.msk.bf16.mxu1 %vm457_vm0, %v2679_v10  ;;  %2324 = vmatpush3.bf16.msra.mxu0 %v2634_v15  ;;  %v1212_v41 = vrot.slane %v1210_v35, 4  ;;  %v1215_v42 = vrot.slane %v1213_v36, 5  ;;  %v1180_v43 = vsel %vm2660_vm4, %v1175_v37, %v1179_v20  ;;  %v2471_v15 = vld [vmem:[%s2654_s10 + $0x30] ss:$8 sps:$4 sm:$0xff]   ;;  %v646_v60 = vshrl.u32 %v626_v54, 16 }
  0x27   : > { %2427 = vmatprep.subr.msk.bf16.mxu0 %vm457_vm0, %v2691_v23  ;;  %v1202_v45 = vor.u32 %v1201_v38, %v1198_v34  ;;  %2279 = vmatprep.mubr.msk.bf16.mxu1 %vm444_vm1, %v2470_v16  ;;  %v1194_v47 = vsel %vm2660_vm4, %v1189_v40, %v1193_v30  ;;  %v1221_v49 = vrot.slane %v1219_v39, 5  ;;  %v649_v61 = vshll.u32 %v626_v54, 16  ;;  %v630_v63 = vld [vmem:[%s2654_s10 + $0x10] sm:$0xf]  ;;  %v631_v6 = vld [vmem:[%s2654_s10 + $0x14] sm:$0x1] }
  0x28   : > { %v1216_v48 = vor.u32 %v1215_v42, %v1212_v41  ;;  %v2109_v50 = vcombine.low %v1180_v43, %v1194_v47  ;;  %v655_v62 = vshll.u32 %v627_v56, 16  ;;  %v660_v2 = vshrl.u32 %v628_v57, 16  ;;  %v632_v11 = vld [vmem:[%s2654_s10 + $0x18] sm:$0xf]  ;;  %v633_v18 = vld [vmem:[%s2654_s10 + $0x1c] sm:$0x1] }
  0x29   : > { %v1203_v51 = vrot.slane %v1202_v45, 4  ;;  %v663_v4 = vshll.u32 %v628_v57, 16  ;;  %v669_v5 = vshll.u32 %v629_v58, 16  ;;  %v648_v7 = vrot.slane %v646_v60, 4  ;;  %v2473_v29 = vld [vmem:[%s2654_s10 + $0x18] ss:$8 sps:$4 sm:$0xff]  }
  0x2a   : > { %v1217_v52 = vrot.slane %v1216_v48, 4  ;;  %2319 = vmatprep.mubr.msk.bf16.mxu0 %vm444_vm1, %v2109_v50  ;;  %v651_v8 = vrot.slane %v649_v61, 5  ;;  %v657_v9 = vrot.slane %v655_v62, 5  ;;  %v674_v12 = vshrl.u32 %v630_v63, 16  ;;  %v2474_v37 = vld [vmem:[%s2654_s10 + $0x28] ss:$8 sps:$4 sm:$0xff]  }
  0x2b   : > { %v1208_v55 = vsel %vm2660_vm4, %v1203_v51, %v1207_v46  ;;  %v662_v13 = vrot.slane %v660_v2, 4  ;;  %v665_v14 = vrot.slane %v663_v4, 5  ;;  %v671_v17 = vrot.slane %v669_v5, 5  ;;  %v634_v40 = vld [vmem:[%s2654_s10 + $0x20] sm:$0xf] }
  0x2c   : > { %2280 = vmatmul.mubr.msk.bf16.gmra.mrb[4].mxu1 %vm444_vm1, %v2471_v15  ;;  %v1222_v59 = vsel %vm2660_vm4, %v1217_v52, %v1221_v49  ;;  %v677_v19 = vshll.u32 %v630_v63, 16  ;;  %v652_v20 = vor.u32 %v651_v8, %v648_v7  ;;  %v676_v21 = vrot.slane %v674_v12, 4  ;;  %v635_v45 = vld [vmem:[%s2654_s10 + $0x24] sm:$0x1]  ;;  %v636_v46 = vld [vmem:[%s2654_s10 + $0x28] sm:$0xf] }
  0x2d   : > { %v2110_v0 = vcombine.low %v1208_v55, %v1222_v59  ;;  %v683_v22 = vshll.u32 %v631_v6, 16  ;;  %v688_v24 = vshrl.u32 %v632_v11, 16  ;;  %v666_v25 = vor.u32 %v665_v14, %v662_v13  ;;  %v637_v48 = vld [vmem:[%s2654_s10 + $0x2c] sm:$0x1]  ;;  %v638_v55 = vld [vmem:[%s2654_s10 + $0x30] sm:$0xf] }
  0x2e   : > { %v679_v26 = vrot.slane %v677_v19, 5  ;;  %v691_v27 = vshll.u32 %v632_v11, 16  ;;  %v697_v28 = vshll.u32 %v633_v18, 16  ;;  %v1488_v30 = vsel %vm457_vm0, %v2691_v23, 0  ;;  %v2738_v23 = vld [vmem:[%s2861_s4 + $0x10] sm:$0x3] }
  0x2f   : > { %2320 = vmatmul.mubr.msk.bf16.gmra.mrb[4].mxu0 %vm444_vm1, %v2110_v0  ;;  %v653_v31 = vrot.slane %v652_v20, 4  ;;  %v685_v32 = vrot.slane %v683_v22, 5  ;;  %v690_v33 = vrot.slane %v688_v24, 4  ;;  %v667_v34 = vrot.slane %v666_v25, 4  ;;  %v639_v60 = vld [vmem:[%s2654_s10 + $0x34] sm:$0x1] }
  0x30   : > { %2325 = vmatprep.mubr.msk.bf16.mxu0 %vm444_vm1, %v2472_v53  ;;  %v680_v35 = vor.u32 %v679_v26, %v676_v21  ;;  %v693_v36 = vrot.slane %v691_v27, 5  ;;  %v699_v39 = vrot.slane %v697_v28, 5  ;;  %v902_v16 = vsel %vm457_vm0, %v2679_v10, 0  ;;  %v2475_v62 = vld [vmem:[%s2654_s10 + $0x38] ss:$8 sps:$4 sm:$0xff]  }
  0x31   : > { %v658_v38 = vsel %vm2660_vm4, %v653_v31, %v657_v9  ;;  %v672_v41 = vsel %vm2660_vm4, %v667_v34, %v671_v17  ;;  %v702_v15 = vshrl.u32 %v634_v40, 16  ;;  %v705_v49 = vshll.u32 %v634_v40, 16  ;;  %v640_v0 = vld [vmem:[%s2654_s10 + $0x38] sm:$0xf]  ;;  %v641_v2 = vld [vmem:[%s2654_s10 + $0x3c] sm:$0x1] }
  0x32   : > { %v681_v42 = vrot.slane %v680_v35, 4  ;;  %v694_v43 = vor.u32 %v693_v36, %v690_v33  ;;  %v2080_v47 = vcombine.low %v658_v38, %v672_v41  ;;  %v711_v10 = vshll.u32 %v635_v45, 16  ;;  %v2476_v14 = vld [vmem:[%s2602_s16 + $0x8] ss:$8 sps:$4 sm:$0xff]   ;;  %v2477_v35 = vld [vmem:[%s2602_s16 + $0x18] ss:$8 sps:$4 sm:$0xff]  }
  0x33   : > { %v716_v50 = vshrl.u32 %v636_v46, 16  ;;  %v704_v53 = vrot.slane %v702_v15, 4  ;;  %v719_v54 = vshll.u32 %v636_v46, 16  ;;  %v707_v56 = vrot.slane %v705_v49, 5  ;;  %v2150_v40 = vld [vmem:[%s2654_s10 + $0xc] sm:$0x1] }
  0x34   : > { %v686_v51 = vsel %vm2660_vm4, %v681_v42, %v685_v32  ;;  %v695_v52 = vrot.slane %v694_v43, 4  ;;  %2285 = vmatprep.mubr.msk.bf16.mxu1 %vm444_vm1, %v2080_v47  ;;  %v713_v57 = vrot.slane %v711_v10, 5  ;;  %v725_v59 = vshll.u32 %v637_v48, 16  ;;  %v2151_v41 = vld [vmem:[%s2654_s10 + $0x10] sm:$0xf] }
  0x35   : > { %v718_v58 = vrot.slane %v716_v50, 4  ;;  %v721_v63 = vrot.slane %v719_v54, 5  ;;  %v730_v4 = vshrl.u32 %v638_v55, 16  ;;  %v708_v6 = vor.u32 %v707_v56, %v704_v53  ;;  %v2152_v42 = vld [vmem:[%s2654_s10 + $0x14] sm:$0x1] }
  0x36   : > { %v700_v61 = vsel %vm2660_vm4, %v695_v52, %v699_v39  ;;  %v727_v7 = vrot.slane %v725_v59, 5  ;;  %v733_v8 = vshll.u32 %v638_v55, 16  ;;  %v739_v12 = vshll.u32 %v639_v60, 16  ;;  %v2480_v39 = vld [vmem:[%s2602_s16 + $0x28] ss:$8 sps:$4 sm:$0xff]  }
  0x37   : > { %2326 = vmatmul.mubr.msk.bf16.vlgmr.msra.gmra.mrb[0].mxu0 %vm444_vm1, %v2473_v29  ;;  %v2081_v5 = vcombine.low %v686_v51, %v700_v61  ;;  %v722_v9 = vor.u32 %v721_v63, %v718_v58  ;;  %v732_v11 = vrot.slane %v730_v4, 4  ;;  %v744_v13 = vshrl.u32 %v640_v0, 16  ;;  %v2153_v48 = vld [vmem:[%s2654_s10 + $0x18] sm:$0xf]  ;;  %v2154_v50 = vld [vmem:[%s2654_s10 + $0x1c] sm:$0x1] }
  0x38   : > { %2334 = vmatpush3.bf16.msra.mxu0 %v1488_v30  ;;  %2329 = vmatprep.mubr.msk.bf16.mxu0 %vm444_vm1, %v2474_v37  ;;  %v709_v17 = vrot.slane %v708_v6, 4  ;;  %v735_v18 = vrot.slane %v733_v8, 5  ;;  %v747_v19 = vshll.u32 %v640_v0, 16  ;;  %v753_v20 = vshll.u32 %v641_v2, 16  ;;  %v2478_v37 = vld [vmem:[%s2626_s30] ss:$8 sps:$4 sm:$0xff]  }
  0x39   : > { %2428 = vmatprep.subr.msk.bf16.mxu0 %vm457_vm0, %v2738_v23  ;;  %2286 = vmatmul.mubr.msk.bf16.vlgmr.msra.gmra.mrb[0].mxu1 %vm444_vm1, %v2081_v5  ;;  %v723_v21 = vrot.slane %v722_v9, 4  ;;  %v746_v22 = vrot.slane %v744_v13, 4  ;;  %v741_v26 = vrot.slane %v739_v12, 5  ;;  %v1718_v34 = vsel %vm457_vm0, %v2738_v23, 0  ;;  %v2155_v51 = vld [vmem:[%s2654_s10 + $0x20] sm:$0xf] }
  0x3a   : > { %2294 = vmatpush3.bf16.msra.mxu1 %v902_v16  ;;  %v714_v24 = vsel %vm2660_vm4, %v709_v17, %v713_v57  ;;  %v736_v25 = vor.u32 %v735_v18, %v732_v11  ;;  %v749_v27 = vrot.slane %v747_v19, 5  ;;  %v755_v32 = vrot.slane %v753_v20, 5  ;;  %v2149_v16 = vld [vmem:[%s2654_s10 + $0x8] sm:$0xf]  ;;  %v2479_v52 = vld [vmem:[%s2626_s30 + $0x10] ss:$8 sps:$4 sm:$0xff]  }
  0x3b   : > { %2424 = vmatprep.subr.msk.bf16.mxu1 %vm457_vm0, %v2574_v1  ;;  %v728_v28 = vsel %vm2660_vm4, %v723_v21, %v727_v7  ;;  %v1580_v43 = vshrl.u32 %v2149_v16, 16  ;;  %v1583_v45 = vshll.u32 %v2149_v16, 16  ;;  %v1589_v23 = vshll.u32 %v2150_v40, 16  ;;  %v2481_v53 = vld [vmem:[%s2602_s16 + $0x38] ss:$8 sps:$4 sm:$0xff]  }
  0x3c   : > { %v2082_v29 = vcombine.low %v714_v24, %v728_v28  ;;  %v737_v30 = vrot.slane %v736_v25, 4  ;;  %v750_v31 = vor.u32 %v749_v27, %v746_v22  ;;  %v1594_v46 = vshrl.u32 %v2151_v41, 16  ;;  %v2156_v58 = vld [vmem:[%s2654_s10 + $0x24] sm:$0x1]  ;;  %v2482_v5 = vld [vmem:[%s2626_s30 + $0x20] ss:$8 sps:$4 sm:$0xff]  }
  0x3d   : > { %v1597_v15 = vshll.u32 %v2151_v41, 16  ;;  %v1603_v47 = vshll.u32 %v2152_v42, 16  ;;  %v1582_v49 = vrot.slane %v1580_v43, 4  ;;  %v1585_v10 = vrot.slane %v1583_v45, 5  ;;  %v2157_v17 = vld [vmem:[%s2654_s10 + $0x28] sm:$0xf] }
  0x3e   : > { %2289 = vmatprep.mubr.msk.bf16.mxu1 %vm444_vm1, %v2082_v29  ;;  %v742_v1 = vsel %vm2660_vm4, %v737_v30, %v741_v26  ;;  %v751_v33 = vrot.slane %v750_v31, 4  ;;  %v1591_v54 = vrot.slane %v1589_v23, 5  ;;  %v1596_v55 = vrot.slane %v1594_v46, 4  ;;  %v2158_v20 = vld [vmem:[%s2654_s10 + $0x2c] sm:$0x1] }
  0x3f   : > { %2330 = vmatmul.mubr.msk.bf16.gmra.mrb[4].mxu0 %vm444_vm1, %v2475_v62  ;;  %v1599_v56 = vrot.slane %v1597_v15, 5  ;;  %v1605_v57 = vrot.slane %v1603_v47, 5  ;;  %v1586_v59 = vor.u32 %v1585_v10, %v1582_v49  ;;  %v1608_v60 = vshrl.u32 %v2153_v48, 16  ;;  %v2159_v21 = vld [vmem:[%s2654_s10 + $0x30] sm:$0xf] }
  0x40   : > { %2335 = vmatprep.mubr.msk.bf16.mxu0 %vm444_vm1, %v2476_v14  ;;  %v756_v36 = vsel %vm2660_vm4, %v751_v33, %v755_v32  ;;  %v1611_v61 = vshll.u32 %v2153_v48, 16  ;;  %v1617_v62 = vshll.u32 %v2154_v50, 16  ;;  %v1622_v0 = vshrl.u32 %v2155_v51, 16  ;;  %v2160_v22 = vld [vmem:[%s2654_s10 + $0x34] sm:$0x1] }
  0x41   : > { %v2083_v38 = vcombine.low %v742_v1, %v756_v36  ;;  %v1600_v63 = vor.u32 %v1599_v56, %v1596_v55  ;;  %v1625_v2 = vshll.u32 %v2155_v51, 16  ;;  %v1631_v4 = vshll.u32 %v2156_v58, 16  ;;  %v2483_v32 = vld [vmem:[%s2626_s30 + $0x30] ss:$8 sps:$4 sm:$0xff]   ;;  %v2162_v16 = vld [vmem:[%s2654_s10 + $0x3c] sm:$0x1] }
  0x42   : > { %v1587_v6 = vrot.slane %v1586_v59, 4  ;;  %v1610_v7 = vrot.slane %v1608_v60, 4  ;;  %v1613_v8 = vrot.slane %v1611_v61, 5  ;;  %v1619_v9 = vrot.slane %v1617_v62, 5  ;;  %v2161_v36 = vld [vmem:[%s2654_s10 + $0x38] sm:$0xf] }
  0x43   : > { %2290 = vmatmul.mubr.msk.bf16.gmra.mrb[4].mxu1 %vm444_vm1, %v2083_v38  ;;  %v1601_v11 = vrot.slane %v1600_v63, 4  ;;  %v1624_v12 = vrot.slane %v1622_v0, 4  ;;  %v1627_v13 = vrot.slane %v1625_v2, 5  ;;  %v1633_v14 = vrot.slane %v1631_v4, 5  ;;  %v2163_v43 = vld [vmem:[%s2654_s10 + $0x40] sm:$0xf] }
  0x44   : > { %2295 = vmatprep.mubr.msk.bf16.mxu1 %vm444_vm1, %v2478_v37  ;;  %v1592_v18 = vsel %vm2660_vm4, %v1587_v6, %v1591_v54  ;;  %v1614_v19 = vor.u32 %v1613_v8, %v1610_v7  ;;  %v1636_v26 = vshrl.u32 %v2157_v17, 16  ;;  %v1639_v27 = vshll.u32 %v2157_v17, 16  ;;  %v2164_v45 = vld [vmem:[%s2654_s10 + $0x44] sm:$0x1]  ;;  %v2484_v15 = vld [vmem:[%s2611_s19 + $0x20] ss:$8 sps:$4 sm:$0xff]  }
  0x45   : > { %v1606_v24 = vsel %vm2660_vm4, %v1601_v11, %v1605_v57  ;;  %v1628_v25 = vor.u32 %v1627_v13, %v1624_v12  ;;  %v1645_v30 = vshll.u32 %v2158_v20, 16  ;;  %v1650_v31 = vshrl.u32 %v2159_v21, 16  ;;  %v2485_v8 = vld [vmem:[%s2611_s19 + $0x30] ss:$8 sps:$4 sm:$0xff]   ;;  %s2186_s19 = sshll.u32 %s2872_s24, 5 }
  0x46   : > { %v2166_v28 = vcombine.low %v1592_v18, %v1606_v24  ;;  %v1615_v29 = vrot.slane %v1614_v19, 4  ;;  %v1638_v33 = vrot.slane %v1636_v26, 4  ;;  %v1664_v23 = vshrl.u32 %v2161_v36, 16  ;;  %v2174_v18 = vld [vmem:[%s2862_s5] ss:$0 sm:$0xff]  ;;  %s2842_s28 = scalar_lea.vmem %s2864_s7, %s2186_s19 }
  0x47   : > { %2336 = vmatmul.mubr.msk.bf16.vlgmr.msra.gmra.mrb[0].mxu0 %vm444_vm1, %v2477_v35  ;;  %v1629_v1 = vrot.slane %v1628_v25, 4  ;;  %v1653_v35 = vshll.u32 %v2159_v21, 16  ;;  %v1647_v37 = vrot.slane %v1645_v30, 5  ;;  %v1652_v38 = vrot.slane %v1650_v31, 4 }
  0x48   : > { %2344 = vmatpush3.bf16.msra.mxu0 %v1718_v34  ;;  %2339 = vmatprep.mubr.msk.bf16.mxu0 %vm444_vm1, %v2480_v39  ;;  %v1641_v34 = vrot.slane %v1639_v27, 5  ;;  %v1659_v39 = vshll.u32 %v2160_v22, 16  ;;  %v1667_v48 = vshll.u32 %v2161_v36, 16  ;;  %v1673_v49 = vshll.u32 %v2162_v16, 16 }
  0x49   : > { %v1634_v40 = vsel %vm2660_vm4, %v1629_v1, %v1633_v14  ;;  %v1655_v42 = vrot.slane %v1653_v35, 5  ;;  %v1666_v51 = vrot.slane %v1664_v23, 4  ;;  %v1681_v54 = vshll.u32 %v2163_v43, 16 }
  0x4a   : > { %v1642_v41 = vor.u32 %v1641_v34, %v1638_v33  ;;  %v1661_v47 = vrot.slane %v1659_v39, 5  ;;  %v1687_v55 = vshll.u32 %v2164_v45, 16  ;;  %v1675_v60 = vrot.slane %v1673_v49, 5 }
  0x4b   : > { %2296 = vmatmul.mubr.msk.bf16.vlgmr.msra.gmra.mrb[0].mxu1 %vm444_vm1, %v2479_v52  ;;  %v1656_v50 = vor.u32 %v1655_v42, %v1652_v38  ;;  %v1678_v52 = vshrl.u32 %v2163_v43, 16  ;;  %v1683_v61 = vrot.slane %v1681_v54, 5 }
  0x4c   : > { %2354 = vmatpush3.bf16.msra.mxu1 %v2582_v3  ;;  %2299 = vmatprep.mubr.msk.bf16.mxu1 %vm444_vm1, %v2482_v5  ;;  %v1620_v3 = vsel %vm2660_vm4, %v1615_v29, %v1619_v9  ;;  %v1643_v10 = vrot.slane %v1642_v41, 4  ;;  %v1689_v4 = vrot.slane %v1687_v55, 5 }
  0x4d   : > { %v2167_v46 = vcombine.low %v1620_v3, %v1634_v40  ;;  %v1657_v57 = vrot.slane %v1656_v50, 4  ;;  %v1680_v58 = vrot.slane %v1678_v52, 4 }
  0x4e   : > { %v1648_v56 = vsel %vm2660_vm4, %v1643_v10, %v1647_v37 }
  0x4f   : > { %2340 = vmatmul.mubr.msk.bf16.gmra.mrb[4].mxu0 %vm444_vm1, %v2481_v53  ;;  %v1669_v53 = vrot.slane %v1667_v48, 5  ;;  %v1662_v62 = vsel %vm2660_vm4, %v1657_v57, %v1661_v47  ;;  %v1684_v2 = vor.u32 %v1683_v61, %v1680_v58 }
  0x50   : > { %2345 = vmatprep.mubr.msk.bf16.mxu0 %vm444_vm1, %v2166_v28  ;;  %v2168_v63 = vcombine.low %v1648_v56, %v1662_v62 }
  0x51   : > { %v1670_v59 = vor.u32 %v1669_v53, %v1666_v51  ;;  %v1685_v6 = vrot.slane %v1684_v2, 4 }
  0x53   : > { %2300 = vmatmul.mubr.msk.bf16.gmra.mrb[4].mxu1 %vm444_vm1, %v2483_v32  ;;  %v1671_v0 = vrot.slane %v1670_v59, 4  ;;  %v1690_v7 = vsel %vm2660_vm4, %v1685_v6, %v1689_v4 }
  0x54   : > { %2309 = vmatprep.mubr.msk.bf16.mxu1 %vm444_vm1, %v2484_v15 }
  0x55   : > { %v1676_v5 = vsel %vm2660_vm4, %v1671_v0, %v1675_v60 }
  0x56   : > { %v2169_v9 = vcombine.low %v1676_v5, %v1690_v7 }
  0x57   : > { %2346 = vmatmul.mubr.msk.bf16.vlgmr.msra.gmra.mrb[0].mxu0 %vm444_vm1, %v2167_v46 }
  0x58   : > { %2349 = vmatprep.mubr.msk.bf16.mxu0 %vm444_vm1, %v2168_v63 }
  0x5f   : > { %2350 = vmatmul.mubr.msk.bf16.gmra.mrb[4].mxu0 %vm444_vm1, %v2169_v9  ;;  %2310 = vmatmul.mubr.msk.bf16.vlgmr.msra.gmra.mrb[4].mxu1 %vm444_vm1, %v2485_v8 }
 0x11e   : > { %v2297_v11 = vpop.f32.mrb[0].mxu1 }
 0x11f   : > { %v938_v12 = vpop.f32.mrb[1].mxu1 }
 0x120   : > { %v2298_v13 = vpop.f32.mrb[2].mxu1 }
 0x121   : > { %v941_v14 = vpop.f32.mrb[3].mxu1 }
 0x12a   : > { %v2347_v17 = vpop.f32.mrb[0].mxu0 }
 0x12b   : > { %v2355_v19 = vadd.f32 %v2347_v17, %v2297_v11  ;;  %v1754_v20 = vpop.f32.mrb[1].mxu0 }
 0x12c   : > { %v2356_v21 = vadd.f32 %v1754_v20, %v938_v12  ;;  %v2348_v22 = vpop.f32.mrb[2].mxu0 }
 0x12d   : > { %v1802_v24 = vmul.f32 %v2355_v19, %v2174_v18  ;;  %v2357_v25 = vadd.f32 %v2348_v22, %v2298_v13  ;;  %v1757_v26 = vpop.f32.mrb[3].mxu0 }
 0x12e   : > { %v1800_v27 = vmul.f32 %v2356_v21, %v2174_v18  ;;  %v2358_v28 = vadd.f32 %v1757_v26, %v941_v14 }
 0x12f   : > { %v1817_v29 = vadd.f32 %v2175_v44, %v1802_v24  ;;  %v1803_v30 = vmul.f32 %v2357_v25, %v2174_v18 }
 0x130   : > { %v1815_v31 = vadd.f32 %v2175_v44, %v1800_v27  ;;  %v1801_v32 = vmul.f32 %v2358_v28, %v2174_v18 }
 0x131   : > { %v1825_v1 = vmax.f32 %v1817_v29, 0.0  ;;  %v1818_v33 = vadd.f32 %v2175_v44, %v1803_v30 }
 0x132   : > { %v1823_v34 = vmax.f32 %v1815_v31, 0.0  ;;  %v1816_v35 = vadd.f32 %v2175_v44, %v1801_v32  ;;  %v2351_v39 = vpop.f32.mrb[4].mxu0  ;;  %v2311_v45 = vpop.f32.mrb[4].mxu1 }
 0x133   : > { %v1833_v36 = vmin.f32 %v1825_v1, 1.0  ;;  %v1826_v3 = vmax.f32 %v1818_v33, 0.0  ;;  %v1770_v41 = vpop.f32.mrb[5].mxu0  ;;  %v2359_v15 = vadd.f32 %v2351_v39, %v2311_v45  ;;  %v1072_v47 = vpop.f32.mrb[5].mxu1 }
 0x134   : > { %v1831_v37 = vmin.f32 %v1823_v34, 1.0  ;;  %v1824_v38 = vmax.f32 %v1816_v35, 0.0  ;;  %v2352_v23 = vpop.f32.mrb[6].mxu0  ;;  %v2360_v10 = vadd.f32 %v1770_v41, %v1072_v47  ;;  %v2312_v50 = vpop.f32.mrb[6].mxu1 }
 0x135   : > { %v1841_v16 = vmul.f32 15.0, %v1833_v36  ;;  %v1834_v40 = vmin.f32 %v1826_v3, 1.0  ;;  %v1773_v48 = vpop.f32.mrb[7].mxu0  ;;  %v1806_v53 = vmul.f32 %v2359_v15, %v2174_v18  ;;  %v2361_v54 = vadd.f32 %v2352_v23, %v2312_v50  ;;  %v1075_v55 = vpop.f32.mrb[7].mxu1 }
 0x136   : > { %v1839_v42 = vmul.f32 15.0, %v1831_v37  ;;  %v1832_v43 = vmin.f32 %v1824_v38, 1.0  ;;  %v1804_v58 = vmul.f32 %v2360_v10, %v2174_v18  ;;  %v2362_v59 = vadd.f32 %v1773_v48, %v1075_v55 }
 0x137   : > { %v1842_v46 = vmul.f32 15.0, %v1834_v40  ;;  %v2432_v51 = vround.rtne.f32 %v1841_v16  ;;  %v1821_v61 = vadd.f32 %v2175_v44, %v1806_v53  ;;  %v1807_v62 = vmul.f32 %v2361_v54, %v2174_v18 }
 0x138   : > { %v1840_v49 = vmul.f32 15.0, %v1832_v43  ;;  %v2430_v56 = vround.rtne.f32 %v1839_v42  ;;  %v1819_v0 = vadd.f32 %v2175_v44, %v1804_v58  ;;  %v1805_v2 = vmul.f32 %v2362_v59, %v2174_v18 }
 0x139   : > { %v2433_v52 = vround.rtne.f32 %v1842_v46  ;;  %v1829_v4 = vmax.f32 %v1821_v61, 0.0  ;;  %v1822_v5 = vadd.f32 %v2175_v44, %v1807_v62 }
 0x13a   : > { %v2431_v57 = vround.rtne.f32 %v1840_v49  ;;  %v1827_v6 = vmax.f32 %v1819_v0, 0.0  ;;  %v1820_v7 = vadd.f32 %v2175_v44, %v1805_v2 }
 0x13b   : > { %v2203_v60 = vpack.c.bf16 %v2433_v52, %v2432_v51  ;;  %v1837_v8 = vmin.f32 %v1829_v4, 1.0  ;;  %v1830_v9 = vmax.f32 %v1822_v5, 0.0 }
 0x13c   : > { %v2198_v63 = vpack.c.bf16 %v2431_v57, %v2430_v56  ;;  %v1835_v11 = vmin.f32 %v1827_v6, 1.0  ;;  %v1828_v12 = vmax.f32 %v1820_v7, 0.0 }
 0x13d   : > { %2215 = vst [vmem:[%s2842_s28 + $0x8] sm:$0xff] %v2203_v60   ;;  %v1845_v13 = vmul.f32 15.0, %v1837_v8  ;;  %v1838_v14 = vmin.f32 %v1830_v9, 1.0 }
 0x13e   : > { %2199 = vst [vmem:[%s2842_s28] sm:$0xff] %v2198_v63   ;;  %v1843_v17 = vmul.f32 15.0, %v1835_v11  ;;  %v1836_v19 = vmin.f32 %v1828_v12, 1.0 }
 0x13f   : > { %v1846_v20 = vmul.f32 15.0, %v1838_v14  ;;  %v2436_v22 = vround.rtne.f32 %v1845_v13 }
 0x140   : > { %v1844_v21 = vmul.f32 15.0, %v1836_v19  ;;  %v2434_v24 = vround.rtne.f32 %v1843_v17 }
 0x141   : > { %v2437_v18 = vround.rtne.f32 %v1846_v20 }
 0x142   : > { %v2435_v25 = vround.rtne.f32 %v1844_v21 }
 0x143   : > { %v2213_v26 = vpack.c.bf16 %v2437_v18, %v2436_v22 }
 0x144   : > { %v2208_v27 = vpack.c.bf16 %v2435_v25, %v2434_v24 }
 0x145   : > { %2217 = vst [vmem:[%s2842_s28 + $0x18] sm:$0xff] %v2213_v26  }
 0x146   : > { %2216 = vst [vmem:[%s2842_s28 + $0x10] sm:$0xff] %v2208_v27  }
 0x147 PF: > { %s17_s26 = sadd.s32 1, %s2508_s26   ;;  %s2867_s24 = smov %s2504_s25 }
 0x148   : > { %p14_p5 = scmp.ge.s32.totalorder %s17_s26, 4   ;;  %s2868_s25 = smov %s2870_s27 }
 0x14a   :  { %16 = sbr.rel (!%p14_p5) target bundleno = 2 (0x2), region = 106 }

// kernel: basic_block_forward.3
= control target key start
LH: loop header
LB: loop body
LE: loop exit
PB: predicated region body
PF: predicated region fallthrough
CT: control target
= control target key end

     0   :  { %s3635_s24 = smov 0   ;;  %s3637_s25 = smov 0   ;;  %s4258_s0 = inlined_call_operand.vmem [shape: bf16[2,10,10,128], index: 0, kind: input, shape index: {}]   ;;  %s4259_s1 = inlined_call_operand.vmem [shape: bf16[9,128,128], index: 1, kind: input, shape index: {}]   ;;  %s4260_s2 = inlined_call_operand.vmem [shape: f32[1,128], index: 2, kind: input, shape index: {}]   ;;  %s4261_s3 = inlined_call_operand.vmem [shape: bf16[2,9,9,4], index: 3, kind: input, shape index: {}]   ;;  %s4262_s4 = inlined_call_operand.vmem [shape: bf16[4,128], index: 4, kind: input, shape index: {}]   ;;  %s4263_s5 = inlined_call_operand.vmem [shape: f32[1,128], index: 5, kind: input, shape index: {}]   ;;  %s4264_s6 = inlined_call_operand.vmem [shape: f32[1,128], index: 6, kind: input, shape index: {}]   ;;  %s4265_s7 = inlined_call_operand.vmem [shape: f32[2,64,128], index: 7, kind: output, shape index: {}]  }
   0x1   :  { %s3639_s26 = smov 0  }
   0x2 LB: > { %s29_s27 = sadd.s32 1, %s3589_s25  ;;  %p2710_p0 = scmp.ge.s32.totalorder %s3593_s26, 1  ;;  %s3593_s26 = sphi %s3639_s26, %s17_s26   ;;  %s3589_s25 = sphi %s3637_s25, %s4271_s25   ;;  %s3585_s24 = sphi %s3635_s24, %s4270_s24  }
   0x3   : > { %p31_p1 = scmp.ge.s32.totalorder %s29_s27, 2  ;;  %p303_p2 = scmp.lt.s32.totalorder %s3593_s26, 3 }
   0x5   : > { %s4273_s27 = smov (%p31_p1, %s29_s27), 0  ;;  %p304_p3 = pnand %p2710_p0, %p303_p2 }
   0x6   : > { %v3483_v0 = vld [vmem:[%s4259_s1 + $0x40] sm:$0xff] (!%p304_p3)   ;;  %p360_p4 = scmp.lt.s32.totalorder (!%p304_p3), %s3585_s24, 1  ;;  %v3485_v2 = vld [vmem:[%s4259_s1 + $0x48] sm:$0xff] (!%p304_p3)   ;;  %v3487_v4 = vld [vmem:[%s4259_s1 + $0x50] sm:$0xff] (!%p304_p3)   ;;  %vm428_vm0 = vsmask.f32 (!%p304_p3), 3328 }
   0x7   : > { %307 = sbr.rel (%p304_p3) target bundleno = 407 (0x197), region = 48  ;;  %v3484_v1 = vld [vmem:[%s4259_s1 + $0x100] sm:$0xff] (!%p304_p3)   ;;  %3166 = vmatprep.subr.bf16.mxu1 (!%p304_p3), %v3483_v0  ;;  %v3486_v3 = vld [vmem:[%s4259_s1 + $0x108] sm:$0xff] (!%p304_p3)   ;;  %v3488_v5 = vld [vmem:[%s4259_s1 + $0x110] sm:$0xff] (!%p304_p3)   ;;  %vm429_vm1 = vsmask.f32 (!%p304_p3), 7440 }
   0x8   : > { %3262 = vmatprep.subr.bf16.mxu0 (!%p304_p3), %v3484_v1  ;;  %3167 = vmatpush3.bf16.msra.mxu1 (!%p304_p3), %v3483_v0  ;;  %v3489_v6 = vld [vmem:[%s4259_s1 + $0x58] sm:$0xff] (!%p304_p3)   ;;  %v3491_v8 = vld [vmem:[%s4259_s1 + $0x60] sm:$0xff] (!%p304_p3)   ;;  %v3493_v10 = vld [vmem:[%s4259_s1 + $0x68] sm:$0xff] (!%p304_p3)   ;;  %vm850_vm3 = vcmask (!%p304_p3), 1042432   ;;  %vm851_vm4 = vcmask (!%p304_p3), 1046532   ;;  %vm2422_vm6 = vcmask (!%p304_p3), 1041408  }
   0x9   : > { %3263 = vmatpush3.bf16.msra.mxu0 (!%p304_p3), %v3484_v1  ;;  %3168 = vmatprep.subr.bf16.mxu1 (!%p304_p3), %v3485_v2  ;;  %v3490_v7 = vld [vmem:[%s4259_s1 + $0x118] sm:$0xff] (!%p304_p3)   ;;  %v3492_v9 = vld [vmem:[%s4259_s1 + $0x120] sm:$0xff] (!%p304_p3)   ;;  %v3494_v14 = vld [vmem:[%s4259_s1 + $0x128] sm:$0xff] (!%p304_p3)   ;;  %vm2409_vm7 = vcmask (!%p304_p3), 31744  }
   0xa   : > { %3264 = vmatprep.subr.bf16.mxu0 (!%p304_p3), %v3486_v3  ;;  %v3495_v22 = vld [vmem:[%s4259_s1 + $0x70] sm:$0xff] (!%p304_p3)   ;;  %v3497_v37 = vld [vmem:[%s4259_s1 + $0x78] sm:$0xff] (!%p304_p3)   ;;  %vm3734_vm2 = vmor (!%p304_p3), %vm428_vm0, %vm429_vm1 }
   0xb   : > { %v3496_v23 = vld [vmem:[%s4259_s1 + $0x130] sm:$0xff] (!%p304_p3)   ;;  %v3498_v47 = vld [vmem:[%s4259_s1 + $0x138] sm:$0xff] (!%p304_p3)   ;;  %v3499_v63 = vld [vmem:[%s4259_s1] sm:$0xff] (!%p304_p3)  }
   0xc   : > { %3169 = vmatpush3.bf16.msra.mxu1 (!%p304_p3), %v3485_v2  ;;  %v3766_v1 = vld [vmem:[%s4259_s1 + $0x140] sm:$0xff] (!%p304_p3)   ;;  %vm3908_vm5 = vmor (!%p304_p3), %vm850_vm3, %vm851_vm4 }
   0xd   : > { %3265 = vmatpush3.bf16.msra.mxu0 (!%p304_p3), %v3486_v3  ;;  %3170 = vmatprep.subr.bf16.mxu1 (!%p304_p3), %v3487_v4 }
   0xe   : > { %s4275_s24 = smov (!%p360_p4, %s3585_s24), 1  ;;  %3266 = vmatprep.subr.bf16.mxu0 %v3488_v5 }
   0xf   : > { %s3457_s21 = smul.u32 80, %s4275_s24  ;;  %s3052_s19 = sshll.u32 %s4275_s24, 6 }
  0x10   : > { %3171 = vmatpush3.bf16.msra.mxu1 %v3487_v4  ;;  %s3458_s22 = smul.u32 72, %s4275_s24 }
  0x11   : > { %3267 = vmatpush3.bf16.msra.mxu0 %v3488_v5  ;;  %3172 = vmatprep.subr.bf16.mxu1 %v3489_v6  ;;  %s3689_s9 = scalar_lea.vmem %s4258_s0, %s3457_s21 }
  0x12   : > { %3268 = vmatprep.subr.bf16.mxu0 %v3490_v7  ;;  %v3695_v11 = vld [vmem:[%s3689_s9] sm:$0xf]  ;;  %v3698_v12 = vld [vmem:[%s3689_s9 + $0x8] sm:$0xf]  ;;  %v3701_v13 = vld [vmem:[%s3689_s9 + $0x4] sm:$0x1]  ;;  %s4127_s11 = scalar_lea.vmem %s4261_s3, %s3458_s22  ;;  %s4239_s22 = scalar_lea.vmem %s4265_s7, %s3052_s19 }
  0x13   : > { %v3707_v15 = vld [vmem:[%s3689_s9 + $0xc] sm:$0x1]  ;;  %v432_v16 = vshrl.u32 %v3695_v11, 16  ;;  %v435_v17 = vshll.u32 %v3695_v11, 16  ;;  %v441_v18 = vshll.u32 %v3701_v13, 16  ;;  %v446_v19 = vshrl.u32 %v3698_v12, 16 }
  0x14   : > { %3173 = vmatpush3.bf16.msra.mxu1 %v3489_v6  ;;  %v449_v20 = vshll.u32 %v3698_v12, 16  ;;  %v455_v21 = vshll.u32 %v3707_v15, 16  ;;  %v2827_v30 = vld [vmem:[%s3689_s9 + $0x8] sm:$0xf]  ;;  %v3723_v31 = vld [vmem:[%s3689_s9 + $0xc] sm:$0x1] }
  0x15   : > { %3269 = vmatpush3.bf16.msra.mxu0 %v3490_v7  ;;  %3174 = vmatprep.subr.bf16.mxu1 %v3491_v8  ;;  %v434_v24 = vrot.slane %v432_v16, 4  ;;  %v437_v25 = vrot.slane %v435_v17, 5  ;;  %v443_v26 = vrot.slane %v441_v18, 5  ;;  %v448_v27 = vrot.slane %v446_v19, 4  ;;  %v2829_v33 = vld [vmem:[%s3689_s9 + $0x10] sm:$0xf] }
  0x16   : > { %3270 = vmatprep.subr.bf16.mxu0 %v3492_v9  ;;  %v451_v28 = vrot.slane %v449_v20, 5  ;;  %v457_v29 = vrot.slane %v455_v21, 5  ;;  %v3727_v34 = vld [vmem:[%s3689_s9 + $0x14] sm:$0x1]  ;;  %v1227_v35 = vshrl.u32 %v2827_v30, 16  ;;  %v1230_v36 = vshll.u32 %v2827_v30, 16 }
  0x17   : > { %v438_v32 = vor.u32 %v437_v25, %v434_v24  ;;  %v1236_v40 = vshll.u32 %v3723_v31, 16  ;;  %v1241_v41 = vshrl.u32 %v2829_v33, 16  ;;  %v1244_v42 = vshll.u32 %v2829_v33, 16  ;;  %v3744_v51 = vld [vmem:[%s3689_s9 + $0x10] sm:$0xf] }
  0x18   : > { %3175 = vmatpush3.bf16.msra.mxu1 %v3491_v8  ;;  %v452_v39 = vor.u32 %v451_v28, %v448_v27  ;;  %v1229_v44 = vrot.slane %v1227_v35, 4  ;;  %v1232_v45 = vrot.slane %v1230_v36, 5  ;;  %v1250_v46 = vshll.u32 %v3727_v34, 16  ;;  %v3749_v55 = vld [vmem:[%s3689_s9 + $0x18] sm:$0xf] }
  0x19   : > { %3271 = vmatpush3.bf16.msra.mxu0 %v3492_v9  ;;  %3176 = vmatprep.subr.bf16.mxu1 %v3493_v10  ;;  %v439_v43 = vrot.slane %v438_v32, 4  ;;  %v1243_v49 = vrot.slane %v1241_v41, 4  ;;  %v1246_v50 = vrot.slane %v1244_v42, 5  ;;  %v1238_v54 = vrot.slane %v1236_v40, 5  ;;  %v3752_v56 = vld [vmem:[%s3689_s9 + $0x14] sm:$0x1] }
  0x1a   : > { %3272 = vmatprep.subr.bf16.mxu0 %v3494_v14  ;;  %v453_v48 = vrot.slane %v452_v39, 4  ;;  %v1233_v53 = vor.u32 %v1232_v45, %v1229_v44  ;;  %v1252_v59 = vrot.slane %v1250_v46, 5  ;;  %v3757_v60 = vld [vmem:[%s3689_s9 + $0x1c] sm:$0x1]  ;;  %v460_v61 = vshrl.u32 %v3744_v51, 16 }
  0x1b   : > { %v444_v52 = vsel %vm3734_vm2, %v439_v43, %v443_v26  ;;  %v1247_v58 = vor.u32 %v1246_v50, %v1243_v49  ;;  %v463_v2 = vshll.u32 %v3744_v51, 16  ;;  %v469_v3 = vshll.u32 %v3752_v56, 16  ;;  %v2831_v8 = vld [vmem:[%s3689_s9 + $0x18] sm:$0xf]  ;;  %v3777_v16 = vld [vmem:[%s3689_s9 + $0x1c] sm:$0x1] }
  0x1c   : > { %3177 = vmatpush3.bf16.msra.mxu1 %v3493_v10  ;;  %v458_v57 = vsel %vm3734_vm2, %v453_v48, %v457_v29  ;;  %v1234_v0 = vrot.slane %v1233_v53, 4  ;;  %v462_v5 = vrot.slane %v460_v61, 4  ;;  %v474_v6 = vshrl.u32 %v3749_v55, 16  ;;  %v2833_v17 = vld [vmem:[%s3689_s9 + $0x20] sm:$0xf]  ;;  %v3501_v43 = vld [vmem:[%s4259_s1 + $0x8] sm:$0xff]  }
  0x1d   : > { %3273 = vmatpush3.bf16.msra.mxu0 %v3494_v14  ;;  %3178 = vmatprep.subr.bf16.mxu1 %v3495_v22  ;;  %v2731_v62 = vcombine.low %v444_v52, %v458_v57  ;;  %v1248_v4 = vrot.slane %v1247_v58, 4  ;;  %v477_v7 = vshll.u32 %v3749_v55, 16  ;;  %v465_v10 = vrot.slane %v463_v2, 5  ;;  %v3783_v21 = vld [vmem:[%s3689_s9 + $0x24] sm:$0x1] }
  0x1e   : > { %3274 = vmatprep.subr.bf16.mxu0 %v3496_v23  ;;  %v1239_v9 = vsel %vm3734_vm2, %v1234_v0, %v1238_v54  ;;  %v483_v14 = vshll.u32 %v3757_v60, 16  ;;  %v476_v19 = vrot.slane %v474_v6, 4  ;;  %v471_v24 = vrot.slane %v469_v3, 5  ;;  %v3502_v54 = vld [vmem:[%s4259_s1 + $0x148] sm:$0xff]   ;;  %v3813_v0 = vld [vmem:[%s3689_s9 + $0x24] sm:$0x1] }
  0x1f   : > { %3182 = vmatprep.mubr.bf16.mxu1 %v2731_v62  ;;  %v1253_v18 = vsel %vm3734_vm2, %v1248_v4, %v1252_v59  ;;  %v479_v20 = vrot.slane %v477_v7, 5  ;;  %v1255_v27 = vshrl.u32 %v2831_v8, 16  ;;  %v1258_v28 = vshll.u32 %v2831_v8, 16  ;;  %v3503_v59 = vld [vmem:[%s4259_s1 + $0x10] sm:$0xff]   ;;  %v3807_v62 = vld [vmem:[%s3689_s9 + $0x20] sm:$0xf] }
  0x20   : > { %3179 = vmatpush3.bf16.msra.mxu1 %v3495_v22  ;;  %v2859_v22 = vcombine.low %v1239_v9, %v1253_v18  ;;  %v485_v25 = vrot.slane %v483_v14, 5  ;;  %v1264_v29 = vshll.u32 %v3777_v16, 16  ;;  %v1269_v32 = vshrl.u32 %v2833_v17, 16  ;;  %v3816_v2 = vld [vmem:[%s3689_s9 + $0x2c] sm:$0x1]  ;;  %v3504_v9 = vld [vmem:[%s4259_s1 + $0x150] sm:$0xff]  }
  0x21   : > { %3275 = vmatpush3.bf16.msra.mxu0 %v3496_v23  ;;  %3180 = vmatprep.subr.bf16.mxu1 %v3497_v37  ;;  %v466_v23 = vor.u32 %v465_v10, %v462_v5  ;;  %v480_v26 = vor.u32 %v479_v20, %v476_v19  ;;  %v1272_v33 = vshll.u32 %v2833_v17, 16  ;;  %v1278_v35 = vshll.u32 %v3783_v21, 16  ;;  %v3505_v10 = vld [vmem:[%s4259_s1 + $0x18] sm:$0xff]  }
  0x22   : > { %3276 = vmatprep.subr.bf16.mxu0 %v3498_v47  ;;  %3278 = vmatprep.mubr.bf16.mxu0 %v2859_v22  ;;  %v1260_v39 = vrot.slane %v1258_v28, 5  ;;  %v1271_v41 = vrot.slane %v1269_v32, 4  ;;  %v1266_v46 = vrot.slane %v1264_v29, 5  ;;  %v1518_v57 = vrot.slane %v3723_v31, 5  ;;  %v3506_v29 = vld [vmem:[%s4259_s1 + $0x158] sm:$0xff]  }
  0x23   : > { %v467_v30 = vrot.slane %v466_v23, 4  ;;  %v481_v36 = vrot.slane %v480_v26, 4  ;;  %v1274_v42 = vrot.slane %v1272_v33, 5  ;;  %v488_v3 = vshrl.u32 %v3807_v62, 16  ;;  %v2835_v23 = vld [vmem:[%s3689_s9 + $0x28] sm:$0xf] }
  0x24   : > { %3181 = vmatpush3.bf16.msra.mxu1 %v3497_v37  ;;  %v1257_v37 = vrot.slane %v1255_v27, 4  ;;  %v491_v4 = vshll.u32 %v3807_v62, 16  ;;  %v497_v5 = vshll.u32 %v3813_v0, 16  ;;  %v511_v8 = vshll.u32 %v3816_v2, 16  ;;  %v3837_v26 = vld [vmem:[%s3689_s9 + $0x34] sm:$0x1] }
  0x25   : > { %3277 = vmatpush3.bf16.msra.mxu0 %v3498_v47  ;;  %3190 = vmatprep.subr.bf16.mxu1 %v3499_v63  ;;  %v472_v40 = vsel %vm3734_vm2, %v467_v30, %v471_v24  ;;  %v486_v44 = vsel %vm3734_vm2, %v481_v36, %v485_v25  ;;  %v1280_v47 = vrot.slane %v1278_v35, 5  ;;  %v1275_v49 = vor.u32 %v1274_v42, %v1271_v41  ;;  %v3833_v24 = vld [vmem:[%s3689_s9 + $0x2c] sm:$0x1]  ;;  %v2837_v25 = vld [vmem:[%s3689_s9 + $0x30] sm:$0xf]  ;;  %v3507_v30 = vld [vmem:[%s4259_s1 + $0x20] sm:$0xff]  }
  0x26   : > { %3286 = vmatprep.subr.bf16.mxu0 %v3766_v1  ;;  %v1261_v45 = vor.u32 %v1260_v39, %v1257_v37  ;;  %v2732_v48 = vcombine.low %v472_v40, %v486_v44  ;;  %v490_v14 = vrot.slane %v488_v3, 4  ;;  %v493_v17 = vrot.slane %v491_v4, 5 }
  0x27   : > { %v1276_v52 = vrot.slane %v1275_v49, 4  ;;  %v499_v18 = vrot.slane %v497_v5, 5  ;;  %v513_v22 = vrot.slane %v511_v8, 5  ;;  %v1283_v27 = vshrl.u32 %v2835_v23, 16  ;;  %v2839_v5 = vld [vmem:[%s3689_s9 + $0x38] sm:$0xf] }
  0x28   : > { %v1262_v50 = vrot.slane %v1261_v45, 4  ;;  %3183 = vmatmul.mubr.bf16.vlgmr.msra.gmra.mrb[0].mxu1 %v2732_v48  ;;  %v1286_v28 = vshll.u32 %v2835_v23, 16  ;;  %v1292_v33 = vshll.u32 %v3833_v24, 16  ;;  %v1297_v35 = vshrl.u32 %v2837_v25, 16 }
  0x29   : > { %3191 = vmatpush3.bf16.msra.mxu1 %v3499_v63  ;;  %v1281_v58 = vsel %vm3734_vm2, %v1276_v52, %v1280_v47  ;;  %v3810_v63 = vld [vmem:[%s3689_s9 + $0x28] sm:$0xf]  ;;  %v1300_v36 = vshll.u32 %v2837_v25, 16  ;;  %v1285_v39 = vrot.slane %v1283_v27, 4  ;;  %v1306_v41 = vshll.u32 %v3837_v26, 16 }
  0x2a   : > { %v1267_v53 = vsel %vm3734_vm2, %v1262_v50, %v1266_v46  ;;  %3192 = vmatprep.subr.bf16.mxu1 %v3501_v43  ;;  %v502_v6 = vshrl.u32 %v3810_v63, 16  ;;  %v505_v7 = vshll.u32 %v3810_v63, 16  ;;  %v1288_v40 = vrot.slane %v1286_v28, 5  ;;  %v3848_v46 = vld [vmem:[%s3689_s9 + $0x30] sm:$0xf] }
  0x2b   : > { %v2860_v61 = vcombine.low %v1267_v53, %v1281_v58  ;;  %v1299_v44 = vrot.slane %v1297_v35, 4  ;;  %v1302_v45 = vrot.slane %v1300_v36, 5  ;;  %v1308_v49 = vrot.slane %v1306_v41, 5  ;;  %v3853_v50 = vld [vmem:[%s3689_s9 + $0x38] sm:$0xf] }
  0x2c   : > { %v504_v19 = vrot.slane %v502_v6, 4  ;;  %v507_v20 = vrot.slane %v505_v7, 5  ;;  %v1289_v48 = vor.u32 %v1288_v40, %v1285_v39  ;;  %v3856_v52 = vld [vmem:[%s3689_s9 + $0x34] sm:$0x1]  ;;  %v516_v53 = vshrl.u32 %v3848_v46, 16  ;;  %v3509_v6 = vld [vmem:[%s4259_s1 + $0x28] sm:$0xff]  }
  0x2d   : > { %3279 = vmatmul.mubr.bf16.vlgmr.msra.gmra.mrb[0].mxu0 %v2860_v61  ;;  %3193 = vmatpush3.bf16.msra.mxu1 %v3501_v43  ;;  %v1294_v43 = vrot.slane %v1292_v33, 5  ;;  %v3865_v61 = vld [vmem:[%s3689_s9 + $0x3c] sm:$0x1]  ;;  %v519_v3 = vshll.u32 %v3848_v46, 16  ;;  %v525_v4 = vshll.u32 %v3856_v52, 16  ;;  %v1311_v28 = vshrl.u32 %v2839_v5, 16 }
  0x2e   : > { %3287 = vmatpush3.bf16.msra.mxu0 %v3766_v1  ;;  %3194 = vmatprep.subr.bf16.mxu1 %v3503_v59  ;;  %v494_v1 = vor.u32 %v493_v17, %v490_v14  ;;  %v508_v32 = vor.u32 %v507_v20, %v504_v19  ;;  %v1290_v8 = vrot.slane %v1289_v48, 4  ;;  %v530_v14 = vshrl.u32 %v3853_v50, 16  ;;  %v3875_v17 = vld [vmem:[%s3689_s9 + $0x3c] sm:$0x1]  ;;  %v3883_v27 = vld [vmem:[%s3689_s9 + $0x44] sm:$0x1] }
  0x2f   : > { %3288 = vmatprep.subr.bf16.mxu0 %v3502_v54  ;;  %v521_v19 = vrot.slane %v519_v3, 5  ;;  %v527_v20 = vrot.slane %v525_v4, 5  ;;  %v539_v25 = vshll.u32 %v3865_v61, 16  ;;  %v1314_v36 = vshll.u32 %v2839_v5, 16 }
  0x30   : > { %v495_v37 = vrot.slane %v494_v1, 4  ;;  %v509_v42 = vrot.slane %v508_v32, 4  ;;  %v1295_v23 = vsel %vm3734_vm2, %v1290_v8, %v1294_v43  ;;  %v532_v1 = vrot.slane %v530_v14, 4  ;;  %v3048_v8 = vld [vmem:[%s4263_s5] ss:$0 sm:$0xff] }
  0x31   : > { %3195 = vmatpush3.bf16.msra.mxu1 %v3503_v59  ;;  %v1303_v59 = vor.u32 %v1302_v45, %v1299_v44  ;;  %v541_v40 = vrot.slane %v539_v25, 5  ;;  %v1313_v41 = vrot.slane %v1311_v28, 4  ;;  %v1316_v45 = vrot.slane %v1314_v36, 5  ;;  %v2873_v25 = vld [vmem:[%s3689_s9 + $0x18] sm:$0xe] }
  0x32   : > { %3289 = vmatpush3.bf16.msra.mxu0 %v3502_v54  ;;  %3196 = vmatprep.subr.bf16.mxu1 %v3505_v10  ;;  %v500_v47 = vsel %vm3734_vm2, %v495_v37, %v499_v18  ;;  %v3508_v54 = vld [vmem:[%s4259_s1 + $0x160] sm:$0xff]   ;;  %v514_v58 = vsel %vm3734_vm2, %v509_v42, %v513_v22  ;;  %v533_v22 = vshll.u32 %v3853_v50, 16  ;;  %v3511_v37 = vld [vmem:[%s4259_s1 + $0x30] sm:$0xff]   ;;  %v1320_v42 = vshll.u32 %v3875_v17, 16  ;;  %v3514_v28 = vld [vmem:[%s4259_s1 + $0x178] sm:$0xff]  }
  0x33   : > { %3290 = vmatprep.subr.bf16.mxu0 %v3504_v9  ;;  %v2733_v7 = vcombine.low %v500_v47, %v514_v58  ;;  %v1304_v18 = vrot.slane %v1303_v59, 4  ;;  %v1522_v47 = vrot.slane %v3727_v34, 5  ;;  %v1526_v48 = vrot.slane %v3777_v16, 5  ;;  %v3512_v58 = vld [vmem:[%s4259_s1 + $0x170] sm:$0xff]  }
  0x34   : > { %v535_v35 = vrot.slane %v533_v22, 5  ;;  %v1317_v4 = vor.u32 %v1316_v45, %v1313_v41  ;;  %v1322_v34 = vrot.slane %v1320_v42, 5  ;;  %v1530_v22 = vrot.slane %v3783_v21, 5  ;;  %v3517_v41 = vld [vmem:[%s4259_s1 + $0x180] sm:$0xff]  }
  0x35   : > { %3197 = vmatpush3.bf16.msra.mxu1 %v3505_v10  ;;  %v518_v10 = vrot.slane %v516_v53, 4  ;;  %3186 = vmatprep.mubr.bf16.mxu1 %v2733_v7  ;;  %v1309_v32 = vsel %vm3734_vm2, %v1304_v18, %v1308_v49  ;;  %v1334_v53 = vshll.u32 %v3883_v27, 16  ;;  %v2871_v7 = vld [vmem:[%s3689_s9 + $0x8] sm:$0xe]  ;;  %v2881_v36 = vrot.slane %v2873_v25, 9 }
  0x36   : > { %3291 = vmatpush3.bf16.msra.mxu0 %v3504_v9  ;;  %3198 = vmatprep.subr.bf16.mxu1 %v3507_v30  ;;  %v2841_v9 = vld [vmem:[%s3689_s9 + $0x40] sm:$0xf]  ;;  %v2861_v39 = vcombine.low %v1295_v23, %v1309_v32  ;;  %v536_v44 = vor.u32 %v535_v35, %v532_v1  ;;  %v2879_v14 = vrot.slane %v2871_v7, 9  ;;  %v1318_v18 = vrot.slane %v1317_v4, 4 }
  0x37   : > { %3292 = vmatprep.subr.bf16.mxu0 %v3506_v29  ;;  %v522_v33 = vor.u32 %v521_v19, %v518_v10  ;;  %v1328_v49 = vshll.u32 %v2841_v9, 16  ;;  %v2872_v10 = vld [vmem:[%s3689_s9 + $0x10] sm:$0xe]  ;;  %v2743_v19 = vcombine.low %v3695_v11, %v3698_v12  ;;  %v1336_v1 = vrot.slane %v1334_v53, 5  ;;  %v2874_v12 = vld [vmem:[%s3689_s9 + $0x20] sm:$0xe] }
  0x38   : > { %3282 = vmatprep.mubr.bf16.mxu0 %v2861_v39  ;;  %v537_v3 = vrot.slane %v536_v44, 4  ;;  %v1519_v32 = vsel %vm3908_vm5, %v2879_v14, %v1518_v57  ;;  %v1323_v21 = vsel %vm3734_vm2, %v1318_v18, %v1322_v34  ;;  %v3516_v35 = vld [vmem:[%s4259_s1 + $0x80] sm:$0xff]   ;;  %v1527_v42 = vsel %vm3908_vm5, %v2881_v36, %v1526_v48  ;;  %v3521_v44 = vld [vmem:[%s4259_s1 + $0x90] sm:$0xff]  }
  0x39   : > { %3199 = vmatpush3.bf16.msra.mxu1 %v3507_v30  ;;  %v3510_v30 = vld [vmem:[%s4259_s1 + $0x168] sm:$0xff]   ;;  %v523_v43 = vrot.slane %v522_v33, 4  ;;  %v1330_v16 = vrot.slane %v1328_v49, 5  ;;  %v1534_v45 = vrot.slane %v3833_v24, 5  ;;  %v1542_v53 = vrot.slane %v3875_v17, 5  ;;  %v3525_v18 = vld [vmem:[%s4259_s1 + $0xa0] sm:$0xff]  }
  0x3a   : > { %3293 = vmatpush3.bf16.msra.mxu0 %v3506_v29  ;;  %3200 = vmatprep.subr.bf16.mxu1 %v3509_v6  ;;  %v1325_v29 = vshrl.u32 %v2841_v9, 16  ;;  %v1546_v24 = vrot.slane %v3883_v27, 5  ;;  %v859_v34 = vrot.slane %v3707_v15, 5  ;;  %v863_v17 = vrot.slane %v3752_v56, 5  ;;  %v827_v15 = vld [vmem:[%s3689_s9 + $0x8] sm:$0xe] }
  0x3b   : > { %3294 = vmatprep.subr.bf16.mxu0 %v3508_v54  ;;  %v528_v59 = vsel %vm3734_vm2, %v523_v43, %v527_v20  ;;  %v2880_v20 = vrot.slane %v2872_v10, 9  ;;  %v3519_v43 = vld [vmem:[%s4259_s1 + $0x88] sm:$0xff]   ;;  %v3522_v10 = vld [vmem:[%s4259_s1 + $0x190] sm:$0xff]   ;;  %v2756_v14 = vrot.slane %v827_v15, 9  ;;  %v830_v36 = vld [vmem:[%s3689_s9 + $0x20] sm:$0xe] }
  0x3c   : > { %v1327_v5 = vrot.slane %v1325_v29, 4  ;;  %v1538_v29 = vrot.slane %v3837_v26, 5  ;;  %v2746_v26 = vcombine.low %v3848_v46, %v3853_v50  ;;  %v3523_v46 = vld [vmem:[%s4259_s1 + $0x98] sm:$0xff]  }
  0x3d   : > { %3201 = vmatpush3.bf16.msra.mxu1 %v3509_v6  ;;  %v3513_v6 = vld [vmem:[%s4259_s1 + $0x38] sm:$0xff]   ;;  %v1523_v11 = vsel %vm3908_vm5, %v2880_v20, %v1522_v47 }
  0x3e   : > { %3295 = vmatpush3.bf16.msra.mxu0 %v3508_v54  ;;  %3202 = vmatprep.subr.bf16.mxu1 %v3511_v37  ;;  %v542_v54 = vsel %vm3734_vm2, %v537_v3, %v541_v40  ;;  %v1331_v23 = vor.u32 %v1330_v16, %v1327_v5  ;;  %v2903_v57 = vcombine.low %v1519_v32, %v1523_v11  ;;  %v826_v16 = vld [vmem:[%s3689_s9] sm:$0xe]  ;;  %v3524_v20 = vld [vmem:[%s4259_s1 + $0x198] sm:$0xff]  }
  0x3f   : > { %3296 = vmatprep.subr.bf16.mxu0 %v3510_v30  ;;  %v2734_v9 = vcombine.low %v528_v59, %v542_v54  ;;  %v2744_v40 = vcombine.low %v3744_v51, %v3749_v55  ;;  %v2745_v51 = vcombine.low %v3807_v62, %v3810_v63  ;;  %v855_v55 = vrot.slane %v3701_v13, 5  ;;  %v3520_v62 = vld [vmem:[%s4259_s1 + $0x188] sm:$0xff]   ;;  %v2876_v63 = vld [vmem:[%s3689_s9 + $0x30] sm:$0xe]  ;;  %v2878_v59 = vld [vmem:[%s3689_s9 + $0x40] sm:$0xe] }
  0x40   : > { %v1332_v33 = vrot.slane %v1331_v23, 4  ;;  %v2875_v13 = vld [vmem:[%s3689_s9 + $0x28] sm:$0xe]  ;;  %v2884_v49 = vrot.slane %v2876_v63, 9  ;;  %v2886_v7 = vrot.slane %v2878_v59, 9  ;;  %v2755_v56 = vrot.slane %v826_v16, 9 }
  0x41   : > { %3203 = vmatpush3.bf16.msra.mxu1 %v3511_v37  ;;  %v2882_v37 = vrot.slane %v2874_v12, 9  ;;  %v2883_v48 = vrot.slane %v2875_v13, 9  ;;  %v867_v54 = vrot.slane %v3757_v60, 5  ;;  %v828_v23 = vld [vmem:[%s3689_s9 + $0x10] sm:$0xe]  ;;  %v3537_v63 = vld [vmem:[%s4259_s1 + $0x1c0] sm:$0xff]  }
  0x42   : > { %3297 = vmatpush3.bf16.msra.mxu0 %v3510_v30  ;;  %3187 = vmatmul.mubr.bf16.gmra.mrb[4].mxu1 %v2734_v9  ;;  %v1337_v31 = vsel %vm3734_vm2, %v1332_v33, %v1336_v1  ;;  %v1539_v4 = vsel %vm3908_vm5, %v2884_v49, %v1538_v29  ;;  %v860_v9 = vsel %vm3908_vm5, %v2756_v14, %v859_v34  ;;  %v829_v60 = vld [vmem:[%s3689_s9 + $0x18] sm:$0xe]  ;;  %v2757_v25 = vrot.slane %v828_v23, 9  ;;  %v3527_v33 = vld [vmem:[%s4259_s1 + $0xa8] sm:$0xff]   ;;  %v4056_v59 = vld [vmem:[%s3689_s9 + $0x1c] sm:$0x1] }
  0x43   : > { %3298 = vmatprep.subr.bf16.mxu0 %v3512_v58  ;;  %3204 = vmatprep.subr.bf16.mxu1 %v3513_v6  ;;  %v2862_v39 = vcombine.low %v1323_v21, %v1337_v31  ;;  %v1531_v30 = vsel %vm3908_vm5, %v2882_v37, %v1530_v22  ;;  %v1535_v3 = vsel %vm3908_vm5, %v2883_v48, %v1534_v45  ;;  %v3536_v32 = vld [vmem:[%s3689_s9 + $0x10] ss:$8 sps:$4 sm:$0xff]   ;;  %v831_v37 = vld [vmem:[%s3689_s9 + $0x28] sm:$0xe]  ;;  %v879_v45 = vrot.slane %v3856_v52, 5 }
  0x44   : > { %3206 = vmatprep.mubr.bf16.mxu1 %v2743_v19  ;;  %v2904_v47 = vcombine.low %v1527_v42, %v1531_v30  ;;  %v2905_v27 = vcombine.low %v1535_v3, %v1539_v4  ;;  %v856_v19 = vsel %vm3908_vm5, %v2755_v56, %v855_v55  ;;  %v864_v11 = vsel %vm3908_vm5, %v2757_v25, %v863_v17  ;;  %v3530_v31 = vld [vmem:[%s4259_s1 + $0xb0] sm:$0xff]   ;;  %v833_v55 = vld [vmem:[%s3689_s9 + $0x38] sm:$0xe]  ;;  %v3539_v52 = vld [vmem:[%s4259_s1 + $0xc8] sm:$0xff]  }
  0x45   : > { %3205 = vmatpush3.bf16.msra.mxu1 %v3513_v6  ;;  %3283 = vmatmul.mubr.bf16.gmra.mrb[4].mxu0 %v2862_v39  ;;  %v1547_v6 = vsel %vm3908_vm5, %v2886_v7, %v1546_v24  ;;  %v2779_v1 = vcombine.low %v856_v19, %v860_v9  ;;  %v3533_v39 = vld [vmem:[%s4259_s1 + $0xb8] sm:$0xff]   ;;  %v2760_v42 = vrot.slane %v831_v37, 9  ;;  %v875_v30 = vrot.slane %v3816_v2, 5  ;;  %v3538_v49 = vld [vmem:[%s3689_s9 + $0x20] ss:$8 sps:$4 sm:$0xff]   ;;  %v3542_v23 = vld [vmem:[%s4259_s1 + $0x1d0] sm:$0xff]  }
  0x46   : > { %3299 = vmatpush3.bf16.msra.mxu0 %v3512_v58  ;;  %3214 = vmatprep.subr.bf16.mxu1 %v3516_v35  ;;  %v2877_v58 = vld [vmem:[%s3689_s9 + $0x38] sm:$0xe]  ;;  %v2762_v13 = vrot.slane %v833_v55, 9  ;;  %v1913_v17 = vshll.u32 %v4056_v59, 16  ;;  %v3546_v37 = vld [vmem:[%s4259_s1 + $0x1e0] sm:$0xff]  }
  0x47   : > { %3300 = vmatprep.subr.bf16.mxu0 %v3514_v28  ;;  %3302 = vmatprep.mubr.bf16.mxu0 %v2903_v57  ;;  %v2885_v5 = vrot.slane %v2877_v58, 9  ;;  %v3528_v57 = vld [vmem:[%s4259_s1 + $0x1a8] sm:$0xff]   ;;  %v876_v2 = vsel %vm3908_vm5, %v2760_v42, %v875_v30  ;;  %v3534_v29 = vld [vmem:[%s4259_s1 + $0x1b8] sm:$0xff]   ;;  %v2959_v42 = vld [vmem:[%s3689_s9 + $0x30] sm:$0xf] }
  0x48   : > { %v2953_v58 = vld [vmem:[%s3689_s9 + $0x18] sm:$0xf]  ;;  %v1946_v55 = vshrl.u32 %v2959_v42, 16 }
  0x49   : > { %v1543_v50 = vsel %vm3908_vm5, %v2885_v5, %v1542_v53  ;;  %v2951_v53 = vld [vmem:[%s3689_s9 + $0x10] sm:$0xf]  ;;  %v1904_v7 = vshrl.u32 %v2953_v58, 16  ;;  %v1907_v34 = vshll.u32 %v2953_v58, 16 }
  0x4a   : > { %3301 = vmatpush3.bf16.msra.mxu0 %v3514_v28  ;;  %3207 = vmatmul.mubr.bf16.vlgmr.msra.gmra.mrb[0].mxu1 %v2744_v40  ;;  %v2906_v22 = vcombine.low %v1543_v50, %v1547_v6  ;;  %v2758_v28 = vrot.slane %v829_v60, 9  ;;  %v2759_v40 = vrot.slane %v830_v36, 9  ;;  %v1890_v3 = vshrl.u32 %v2951_v53, 16  ;;  %v3540_v50 = vld [vmem:[%s4259_s1 + $0x1c8] sm:$0xff]   ;;  %v3550_v6 = vld [vmem:[%s3689_s9 + $0x30] ss:$8 sps:$4 sm:$0xff]  }
  0x4b   : > { %3310 = vmatprep.subr.bf16.mxu0 %v3517_v41  ;;  %3215 = vmatpush3.bf16.msra.mxu1 %v3516_v35  ;;  %v3526_v35 = vld [vmem:[%s4259_s1 + $0x1a0] sm:$0xff]   ;;  %v1893_v4 = vshll.u32 %v2951_v53, 16  ;;  %v1906_v15 = vrot.slane %v1904_v7, 4  ;;  %v1909_v56 = vrot.slane %v1907_v34, 5  ;;  %v3551_v7 = vld [vmem:[%s4259_s1 + $0x1f0] sm:$0xff]   ;;  %v3553_v34 = vld [vmem:[%s4259_s1 + $0xf8] sm:$0xff]  }
  0x4c   : > { %3216 = vmatprep.subr.bf16.mxu1 %v3519_v43  ;;  %3210 = vmatprep.mubr.bf16.mxu1 %v2745_v51  ;;  %v868_v12 = vsel %vm3908_vm5, %v2758_v28, %v867_v54  ;;  %v832_v51 = vld [vmem:[%s3689_s9 + $0x30] sm:$0xe]  ;;  %v1892_v16 = vrot.slane %v1890_v3, 4  ;;  %v2955_v28 = vld [vmem:[%s3689_s9 + $0x20] sm:$0xf] }
  0x4d   : > { %3303 = vmatmul.mubr.bf16.vlgmr.msra.gmra.mrb[0].mxu0 %v2904_v47  ;;  %v2780_v21 = vcombine.low %v864_v11, %v868_v12  ;;  %v883_v47 = vrot.slane %v3865_v61, 5  ;;  %v4048_v61 = vld [vmem:[%s3689_s9 + $0x14] sm:$0x1]  ;;  %v1910_v19 = vor.u32 %v1909_v56, %v1906_v15  ;;  %v2957_v12 = vld [vmem:[%s3689_s9 + $0x28] sm:$0xf] }
  0x4e   : > { %3311 = vmatpush3.bf16.msra.mxu0 %v3517_v41  ;;  %3306 = vmatprep.mubr.bf16.mxu0 %v2905_v27  ;;  %v871_v41 = vrot.slane %v3813_v0, 5  ;;  %v1899_v5 = vshll.u32 %v4048_v61, 16  ;;  %v3541_v27 = vld [vmem:[%s4259_s1 + $0xd0] sm:$0xff]   ;;  %v1935_v36 = vshll.u32 %v2957_v12, 16 }
  0x4f   : > { %3217 = vmatpush3.bf16.msra.mxu1 %v3519_v43  ;;  %3312 = vmatprep.subr.bf16.mxu0 %v3520_v62  ;;  %v3531_v43 = vld [vmem:[%s4259_s1 + $0x1b0] sm:$0xff]   ;;  %v1911_v60 = vrot.slane %v1910_v19, 4  ;;  %v3554_v19 = vld [vmem:[%s4259_s1 + $0x1f8] sm:$0xff]  }
  0x50   : > { %3218 = vmatprep.subr.bf16.mxu1 %v3521_v44  ;;  %v872_v0 = vsel %vm3908_vm5, %v2759_v40, %v871_v41  ;;  %v1901_v54 = vrot.slane %v1899_v5, 5  ;;  %v4094_v40 = vld [vmem:[%s3689_s9 + $0x24] sm:$0x1]  ;;  %v4097_v41 = vld [vmem:[%s3689_s9 + $0x2c] sm:$0x1] }
  0x51   : > { %v2781_v48 = vcombine.low %v872_v0, %v876_v2  ;;  %v1937_v2 = vrot.slane %v1935_v36, 5  ;;  %v4116_v5 = vld [vmem:[%s3689_s9 + $0x3c] sm:$0x1] }
  0x52   : > { %3211 = vmatmul.mubr.bf16.gmra.mrb[4].mxu1 %v2746_v26  ;;  %3313 = vmatpush3.bf16.msra.mxu0 %v3520_v62  ;;  %v2761_v62 = vrot.slane %v832_v51, 9  ;;  %v884_v26 = vsel %vm3908_vm5, %v2762_v13, %v883_v47  ;;  %v2961_v51 = vld [vmem:[%s3689_s9 + $0x38] sm:$0xf]  ;;  %v3548_v47 = vld [vmem:[%s4259_s1 + $0x1e8] sm:$0xff]   ;;  %v1927_v13 = vshll.u32 %v4094_v40, 16  ;;  %v1969_v56 = vshll.u32 %v4116_v5, 16 }
  0x53   : > { %3219 = vmatpush3.bf16.msra.mxu1 %v3521_v44  ;;  %3314 = vmatprep.subr.bf16.mxu0 %v3522_v10  ;;  %v3535_v44 = vld [vmem:[%s4259_s1 + $0xc0] sm:$0xff]  }
  0x54   : > { %3220 = vmatprep.subr.bf16.mxu1 %v3523_v46  ;;  %3230 = vmatprep.mubr.bf16.mxu1 %v2779_v1  ;;  %v880_v24 = vsel %vm3908_vm5, %v2761_v62, %v879_v45  ;;  %v3552_v1 = vld [vmem:[%s3689_s9 + $0x40] ss:$8 sps:$4 sm:$0xff]   ;;  %v1960_v45 = vshrl.u32 %v2961_v51, 16  ;;  %v3549_v62 = vld [vmem:[%s4259_s1 + $0xf0] sm:$0xff]  }
  0x55   : > { %3307 = vmatmul.mubr.bf16.gmra.mrb[4].mxu0 %v2906_v22  ;;  %v3543_v22 = vld [vmem:[%s4259_s1 + $0xd8] sm:$0xff]  }
  0x56   : > { %3315 = vmatpush3.bf16.msra.mxu0 %v3522_v10  ;;  %3326 = vmatprep.mubr.bf16.mxu0 %v3536_v32  ;;  %v2782_v10 = vcombine.low %v880_v24, %v884_v26  ;;  %v3544_v32 = vld [vmem:[%s4259_s1 + $0x1d8] sm:$0xff]   ;;  %v1962_v53 = vrot.slane %v1960_v45, 4  ;;  %v2965_v26 = vld [vmem:[%s3689_s9 + $0x48] sm:$0xf] }
  0x57   : > { %3221 = vmatpush3.bf16.msra.mxu1 %v3523_v46  ;;  %3316 = vmatprep.subr.bf16.mxu0 %v3524_v20  ;;  %v1895_v46 = vrot.slane %v1893_v4, 5  ;;  %v4113_v4 = vld [vmem:[%s3689_s9 + $0x34] sm:$0x1] }
  0x58   : > { %3222 = vmatprep.subr.bf16.mxu1 %v3525_v18 }
  0x59   : > { %v1896_v14 = vor.u32 %v1895_v46, %v1892_v16  ;;  %v1988_v16 = vshrl.u32 %v2965_v26, 16  ;;  %v1991_v46 = vshll.u32 %v2965_v26, 16 }
  0x5a   : > { %3317 = vmatpush3.bf16.msra.mxu0 %v3524_v20  ;;  %v1915_v20 = vrot.slane %v1913_v17, 5 }
  0x5b   : > { %3223 = vmatpush3.bf16.msra.mxu1 %v3525_v18  ;;  %3318 = vmatprep.subr.bf16.mxu0 %v3526_v35  ;;  %v3555_v18 = vld [vmem:[%s3689_s9 + $0x8] ss:$8 sps:$4 sm:$0xff]   ;;  %v1897_v9 = vrot.slane %v1896_v14, 4  ;;  %v1929_v14 = vrot.slane %v1927_v13, 5 }
  0x5c   : > { %3224 = vmatprep.subr.bf16.mxu1 %v3527_v33  ;;  %v1916_v11 = vsel %vm3734_vm2, %v1911_v60, %v1915_v20  ;;  %v2388_v20 = vld [vmem:[%s4262_s4] sm:$0x3]  ;;  %v1990_v60 = vrot.slane %v1988_v16, 4  ;;  %v3558_v13 = vld [vmem:[%s4259_s1 + $0x208] sm:$0xff]  }
  0x5d   : > { %v1902_v25 = vsel %vm3734_vm2, %v1897_v9, %v1901_v54  ;;  %v2424_v36 = vsel %vm2422_vm6, %v2388_v20, 0  ;;  %v3563_v16 = vld [vmem:[%s4259_s1 + $0x220] sm:$0xff]  }
  0x5e   : > { %3319 = vmatpush3.bf16.msra.mxu0 %v3526_v35  ;;  %v1918_v35 = vshrl.u32 %v2955_v28, 16 }
  0x5f   : > { %3225 = vmatpush3.bf16.msra.mxu1 %v3527_v33  ;;  %3320 = vmatprep.subr.bf16.mxu0 %v3528_v57  ;;  %v2983_v33 = vcombine.low %v1902_v25, %v1916_v11  ;;  %v1971_v11 = vrot.slane %v1969_v56, 5  ;;  %v2998_v56 = vld [vmem:[%s3689_s9 + $0x28] sm:$0xe] }
  0x60   : > { %3226 = vmatprep.subr.bf16.mxu1 %v3530_v31  ;;  %v1920_v30 = vrot.slane %v1918_v35, 4 }
  0x62   : > { %3321 = vmatpush3.bf16.msra.mxu0 %v3528_v57  ;;  %v1932_v57 = vshrl.u32 %v2957_v12, 16  ;;  %v4141_v12 = vld [vmem:[%s3689_s9 + $0x4c] sm:$0x1] }
  0x63   : > { %3227 = vmatpush3.bf16.msra.mxu1 %v3530_v31  ;;  %3322 = vmatprep.subr.bf16.mxu0 %v3531_v43  ;;  %v1921_v31 = vshll.u32 %v2955_v28, 16 }
  0x64   : > { %3228 = vmatprep.subr.bf16.mxu1 %v3533_v39  ;;  %v1934_v0 = vrot.slane %v1932_v57, 4 }
  0x66   : > { %3323 = vmatpush3.bf16.msra.mxu0 %v3531_v43  ;;  %v1923_v43 = vrot.slane %v1921_v31, 5  ;;  %v1938_v3 = vor.u32 %v1937_v2, %v1934_v0  ;;  %v3559_v31 = vld [vmem:[%s3689_s9 + $0x28] ss:$8 sps:$4 sm:$0xff]  }
  0x67   : > { %3229 = vmatpush3.bf16.msra.mxu1 %v3533_v39  ;;  %3324 = vmatprep.subr.bf16.mxu0 %v3534_v29  ;;  %v3547_v39 = vld [vmem:[%s4259_s1 + $0xe8] sm:$0xff]  }
  0x68   : > { %3238 = vmatprep.subr.bf16.mxu1 %v3535_v44  ;;  %v1924_v58 = vor.u32 %v1923_v43, %v1920_v30  ;;  %v1939_v54 = vrot.slane %v1938_v3, 4  ;;  %v3557_v30 = vld [vmem:[%s4259_s1 + $0x200] sm:$0xff]  }
  0x6a   : > { %3231 = vmatmul.mubr.bf16.vlgmr.msra.gmra.mrb[0].mxu1 %v2780_v21  ;;  %3325 = vmatpush3.bf16.msra.mxu0 %v3534_v29  ;;  %v3545_v21 = vld [vmem:[%s4259_s1 + $0xe0] sm:$0xff]   ;;  %v1963_v29 = vshll.u32 %v2961_v51, 16 }
  0x6b   : > { %3239 = vmatpush3.bf16.msra.mxu1 %v3535_v44  ;;  %3234 = vmatprep.mubr.bf16.mxu1 %v2781_v48  ;;  %v1949_v44 = vshll.u32 %v2959_v42, 16  ;;  %v1948_v48 = vrot.slane %v1946_v55, 4  ;;  %v1997_v42 = vshll.u32 %v4141_v12, 16  ;;  %v2995_v55 = vld [vmem:[%s3689_s9 + $0x10] sm:$0xe] }
  0x6c   : > { %3240 = vmatprep.subr.bf16.mxu1 %v3539_v52  ;;  %3334 = vmatprep.subr.bf16.mxu0 %v3537_v63  ;;  %v1965_v24 = vrot.slane %v1963_v29, 5 }
  0x6d   : > { %3327 = vmatmul.mubr.bf16.vlgmr.msra.gmra.mrb[0].mxu0 %v3538_v49  ;;  %v2963_v49 = vld [vmem:[%s3689_s9 + $0x40] sm:$0xf] }
  0x6e   : > { %3335 = vmatpush3.bf16.msra.mxu0 %v3537_v63  ;;  %3330 = vmatprep.mubr.bf16.mxu0 %v3550_v6  ;;  %v1941_v63 = vshll.u32 %v4097_v41, 16  ;;  %v1974_v17 = vshrl.u32 %v2963_v49, 16  ;;  %v1955_v6 = vshll.u32 %v4113_v4, 16  ;;  %v1966_v15 = vor.u32 %v1965_v24, %v1962_v53  ;;  %v3560_v53 = vld [vmem:[%s3689_s9 + $0x38] ss:$8 sps:$4 sm:$0xff]  }
  0x6f   : > { %3241 = vmatpush3.bf16.msra.mxu1 %v3539_v52  ;;  %3336 = vmatprep.subr.bf16.mxu0 %v3540_v50  ;;  %v1951_v52 = vrot.slane %v1949_v44, 5  ;;  %v2996_v44 = vld [vmem:[%s3689_s9 + $0x18] sm:$0xe]  ;;  %v3567_v24 = vld [vmem:[%s4127_s11] ss:$8 sps:$4 sm:$0xff]  }
  0x70   : > { %3242 = vmatprep.subr.bf16.mxu1 %v3541_v27  ;;  %v1976_v9 = vrot.slane %v1974_v17, 4  ;;  %v1957_v28 = vrot.slane %v1955_v6, 5  ;;  %v3568_v17 = vld [vmem:[%s4127_s11 + $0x10] ss:$8 sps:$4 sm:$0xff]  }
  0x71   : > { %v3565_v6 = vld [vmem:[%s4259_s1 + $0x230] sm:$0xff]  }
  0x72   : > { %3235 = vmatmul.mubr.bf16.gmra.mrb[4].mxu1 %v2782_v10  ;;  %3337 = vmatpush3.bf16.msra.mxu0 %v3540_v50  ;;  %v1952_v50 = vor.u32 %v1951_v52, %v1948_v48  ;;  %v1925_v10 = vrot.slane %v1924_v58, 4  ;;  %v2181_v48 = vrot.slane %v4048_v61, 5  ;;  %v3004_v52 = vrot.slane %v2996_v44, 9  ;;  %v3561_v61 = vld [vmem:[%s4259_s1 + $0x210] sm:$0xff]  }
  0x73   : > { %3243 = vmatpush3.bf16.msra.mxu1 %v3541_v27  ;;  %3254 = vmatprep.mubr.bf16.mxu1 %v3555_v18  ;;  %v1977_v27 = vshll.u32 %v2963_v49, 16  ;;  %v1943_v18 = vrot.slane %v1941_v63, 5  ;;  %v3003_v63 = vrot.slane %v2995_v55, 9  ;;  %v2185_v49 = vrot.slane %v4056_v59, 5 }
  0x74   : > { %3244 = vmatprep.subr.bf16.mxu1 %v3543_v22  ;;  %3338 = vmatprep.subr.bf16.mxu0 %v3542_v23  ;;  %v1953_v25 = vrot.slane %v1952_v50, 4  ;;  %v3570_v50 = vld [vmem:[%s4127_s11 + $0x30] ss:$8 sps:$4 sm:$0xff]  }
  0x75   : > { %3331 = vmatmul.mubr.bf16.gmra.mrb[4].mxu0 %v3552_v1  ;;  %v1993_v1 = vrot.slane %v1991_v46, 5  ;;  %v1944_v35 = vsel %vm3734_vm2, %v1939_v54, %v1943_v18  ;;  %v2182_v59 = vsel %vm3908_vm5, %v3003_v63, %v2181_v48  ;;  %v2186_v3 = vsel %vm3908_vm5, %v3004_v52, %v2185_v49  ;;  %v3564_v46 = vld [vmem:[%s4259_s1 + $0x228] sm:$0xff]   ;;  %v3039_v52 = vld [vmem:[%s4260_s2] ss:$0 sm:$0xff] }
  0x76   : > { %3339 = vmatpush3.bf16.msra.mxu0 %v3542_v23  ;;  %3350 = vmatprep.mubr.bf16.mxu0 %v2983_v33  ;;  %v1979_v23 = vrot.slane %v1977_v27, 5  ;;  %v1930_v33 = vsel %vm3734_vm2, %v1925_v10, %v1929_v14  ;;  %v1958_v43 = vsel %vm3734_vm2, %v1953_v25, %v1957_v28  ;;  %v3027_v38 = vcombine.low %v2182_v59, %v2186_v3  ;;  %v3569_v27 = vld [vmem:[%s4127_s11 + $0x20] ss:$8 sps:$4 sm:$0xff]   ;;  %v2999_v10 = vld [vmem:[%s3689_s9 + $0x30] sm:$0xe] }
  0x77   : > { %3245 = vmatpush3.bf16.msra.mxu1 %v3543_v22  ;;  %3340 = vmatprep.subr.bf16.mxu0 %v3544_v32  ;;  %v4138_v22 = vld [vmem:[%s3689_s9 + $0x44] sm:$0x1]  ;;  %v2984_v0 = vcombine.low %v1930_v33, %v1944_v35  ;;  %v3000_v14 = vld [vmem:[%s3689_s9 + $0x38] sm:$0xe]  ;;  %v2189_v18 = vrot.slane %v4094_v40, 5  ;;  %v2201_v25 = vrot.slane %v4116_v5, 5 }
  0x78   : > { %3246 = vmatprep.subr.bf16.mxu1 %v3545_v21  ;;  %v1983_v57 = vshll.u32 %v4138_v22, 16  ;;  %v2205_v35 = vrot.slane %v4138_v22, 5 }
  0x7a   : > { %3341 = vmatpush3.bf16.msra.mxu0 %v3544_v32  ;;  %v1967_v32 = vrot.slane %v1966_v15, 4  ;;  %v1985_v2 = vrot.slane %v1983_v57, 5  ;;  %v2997_v15 = vld [vmem:[%s3689_s9 + $0x20] sm:$0xe]  ;;  %v2209_v57 = vrot.slane %v4141_v12, 5 }
  0x7b   : > { %3247 = vmatpush3.bf16.msra.mxu1 %v3545_v21  ;;  %3342 = vmatprep.subr.bf16.mxu0 %v3546_v37  ;;  %v3556_v21 = vld [vmem:[%s3689_s9 + $0x18] ss:$8 sps:$4 sm:$0xff]   ;;  %v3005_v54 = vrot.slane %v2997_v15, 9 }
  0x7c   : > { %3248 = vmatprep.subr.bf16.mxu1 %v3547_v39  ;;  %v1972_v51 = vsel %vm3734_vm2, %v1967_v32, %v1971_v11  ;;  %v3001_v32 = vld [vmem:[%s3689_s9 + $0x40] sm:$0xe] }
  0x7d   : > { %v2985_v45 = vcombine.low %v1958_v43, %v1972_v51  ;;  %v2190_v28 = vsel %vm3908_vm5, %v3005_v54, %v2189_v18  ;;  %v3009_v33 = vrot.slane %v3001_v32, 9 }
  0x7e   : > { %3343 = vmatpush3.bf16.msra.mxu0 %v3546_v37  ;;  %v1980_v37 = vor.u32 %v1979_v23, %v1976_v9  ;;  %v3566_v9 = vld [vmem:[%s4259_s1 + $0x238] sm:$0xff]   ;;  %v3007_v23 = vrot.slane %v2999_v10, 9 }
  0x7f   : > { %3249 = vmatpush3.bf16.msra.mxu1 %v3547_v39  ;;  %3344 = vmatprep.subr.bf16.mxu0 %v3548_v47  ;;  %v1994_v39 = vor.u32 %v1993_v1, %v1990_v60  ;;  %v2197_v60 = vrot.slane %v4113_v4, 5  ;;  %v3008_v1 = vrot.slane %v3000_v14, 9 }
  0x80   : > { %3250 = vmatprep.subr.bf16.mxu1 %v3549_v62  ;;  %v1981_v29 = vrot.slane %v1980_v37, 4 }
  0x81   : > { %v2202_v11 = vsel %vm3908_vm5, %v3008_v1, %v2201_v25 }
  0x82   : > { %3345 = vmatpush3.bf16.msra.mxu0 %v3548_v47  ;;  %v1995_v47 = vrot.slane %v1994_v39, 4  ;;  %v1986_v26 = vsel %vm3734_vm2, %v1981_v29, %v1985_v2 }
  0x83   : > { %3251 = vmatpush3.bf16.msra.mxu1 %v3549_v62  ;;  %3346 = vmatprep.subr.bf16.mxu0 %v3551_v7  ;;  %v1999_v62 = vrot.slane %v1997_v42, 5 }
  0x84   : > { %3252 = vmatprep.subr.bf16.mxu1 %v3553_v34 }
  0x85   : > { %v2000_v58 = vsel %vm3734_vm2, %v1995_v47, %v1999_v62 }
  0x86   : > { %3347 = vmatpush3.bf16.msra.mxu0 %v3551_v7  ;;  %v2986_v7 = vcombine.low %v1986_v26, %v2000_v58 }
  0x87   : > { %3253 = vmatpush3.bf16.msra.mxu1 %v3553_v34  ;;  %3348 = vmatprep.subr.bf16.mxu0 %v3554_v19  ;;  %v3562_v34 = vld [vmem:[%s4259_s1 + $0x218] sm:$0xff]  }
  0x88   : > { %3456 = vmatprep.subr.msk.bf16.mxu1 %vm2422_vm6, %v2388_v20  ;;  %v2193_v20 = vrot.slane %v4097_v41, 5  ;;  %v2198_v41 = vsel %vm3908_vm5, %v3007_v23, %v2197_v60 }
  0x89   : > { %v3029_v5 = vcombine.low %v2198_v41, %v2202_v11 }
  0x8a   : > { %3255 = vmatmul.mubr.bf16.vlgmr.msra.gmra.mrb[0].mxu1 %v3556_v21  ;;  %3349 = vmatpush3.bf16.msra.mxu0 %v3554_v19  ;;  %v3006_v19 = vrot.slane %v2998_v56, 9  ;;  %v3002_v21 = vld [vmem:[%s3689_s9 + $0x48] sm:$0xe] }
  0x8b   : > { %3258 = vmatprep.mubr.bf16.mxu1 %v3559_v31  ;;  %3383 = vmatpush3.bf16.msra.mxu1 %v2424_v36  ;;  %v3010_v31 = vrot.slane %v3002_v21, 9  ;;  %v2206_v36 = vsel %vm3908_vm5, %v3009_v33, %v2205_v35 }
  0x8c   : > { %3358 = vmatprep.subr.bf16.mxu0 %v3557_v30  ;;  %v2194_v40 = vsel %vm3908_vm5, %v3006_v19, %v2193_v20 }
  0x8d   : > { %3351 = vmatmul.mubr.bf16.vlgmr.msra.gmra.mrb[0].mxu0 %v2984_v0  ;;  %v3028_v4 = vcombine.low %v2190_v28, %v2194_v40  ;;  %v2210_v37 = vsel %vm3908_vm5, %v3010_v31, %v2209_v57 }
  0x8e   : > { %3359 = vmatpush3.bf16.msra.mxu0 %v3557_v30  ;;  %3354 = vmatprep.mubr.bf16.mxu0 %v2985_v45  ;;  %v3030_v39 = vcombine.low %v2206_v36, %v2210_v37 }
  0x8f   : > { %3360 = vmatprep.subr.bf16.mxu0 %v3558_v13 }
  0x92   : > { %3259 = vmatmul.mubr.bf16.gmra.mrb[4].mxu1 %v3560_v53  ;;  %3361 = vmatpush3.bf16.msra.mxu0 %v3558_v13 }
  0x93   : > { %3384 = vmatprep.mubr.msk.bf16.mxu1 %vm2409_vm7, %v3567_v24  ;;  %3362 = vmatprep.subr.bf16.mxu0 %v3561_v61 }
  0x95   : > { %3355 = vmatmul.mubr.bf16.gmra.mrb[4].mxu0 %v2986_v7 }
  0x96   : > { %3363 = vmatpush3.bf16.msra.mxu0 %v3561_v61  ;;  %3374 = vmatprep.mubr.bf16.mxu0 %v3027_v38  ;;  %v3049_v38 = vld [vmem:[%s4264_s6] ss:$0 sm:$0xff] }
  0x97   : > { %3364 = vmatprep.subr.bf16.mxu0 %v3562_v34 }
  0x9a   : > { %3385 = vmatmul.mubr.msk.bf16.vlgmr.msra.gmra.mrb[8].mxu1 %vm2409_vm7, %v3568_v17  ;;  %3365 = vmatpush3.bf16.msra.mxu0 %v3562_v34 }
  0x9b   : > { %3388 = vmatprep.mubr.msk.bf16.mxu1 %vm2409_vm7, %v3569_v27  ;;  %3366 = vmatprep.subr.bf16.mxu0 %v3563_v16 }
  0x9e   : > { %3367 = vmatpush3.bf16.msra.mxu0 %v3563_v16 }
  0x9f   : > { %3368 = vmatprep.subr.bf16.mxu0 %v3564_v46 }
  0xa2   : > { %3389 = vmatmul.mubr.msk.bf16.gmra.mrb[12].mxu1 %vm2409_vm7, %v3570_v50  ;;  %3369 = vmatpush3.bf16.msra.mxu0 %v3564_v46 }
  0xa3   : > { %3370 = vmatprep.subr.bf16.mxu0 %v3565_v6 }
  0xa6   : > { %3371 = vmatpush3.bf16.msra.mxu0 %v3565_v6 }
  0xa7   : > { %3372 = vmatprep.subr.bf16.mxu0 %v3566_v9 }
  0xaa   : > { %3373 = vmatpush3.bf16.msra.mxu0 %v3566_v9 }
  0xad   : > { %3375 = vmatmul.mubr.bf16.vlgmr.msra.gmra.mrb[0].mxu0 %v3028_v4 }
  0xae   : > { %3378 = vmatprep.mubr.bf16.mxu0 %v3029_v5 }
  0xb5   : > { %3379 = vmatmul.mubr.bf16.gmra.mrb[4].mxu0 %v3030_v39 }
 0x15d   : > { %v3256_v42 = vpop.f32.mrb[0].mxu1 }
 0x15e   : > { %v1171_v30 = vpop.f32.mrb[1].mxu1 }
 0x15f   : > { %v3257_v43 = vpop.f32.mrb[2].mxu1 }
 0x160   : > { %v1174_v51 = vpop.f32.mrb[3].mxu1 }
 0x165   : > { %v3260_v55 = vpop.f32.mrb[4].mxu1 }
 0x166   : > { %v1187_v44 = vpop.f32.mrb[5].mxu1 }
 0x167   : > { %v3261_v22 = vpop.f32.mrb[6].mxu1 }
 0x168   : > { %v1190_v0 = vpop.f32.mrb[7].mxu1 }
 0x16d   : > { %v3386_v2 = vpop.f32.mrb[8].mxu1 }
 0x16e   : > { %v2460_v12 = vpop.f32.mrb[9].mxu1  ;;  %v2500_v49 = vmul.f32 %v3386_v2, %v3048_v8 }
 0x16f   : > { %v3387_v45 = vpop.f32.mrb[10].mxu1  ;;  %v2498_v26 = vmul.f32 %v3048_v8, %v2460_v12 }
 0x170   : > { %v2463_v29 = vpop.f32.mrb[11].mxu1  ;;  %v2501_v16 = vmul.f32 %v3387_v45, %v3048_v8 }
 0x171   : > { %v2499_v6 = vmul.f32 %v3048_v8, %v2463_v29 }
 0x175   : > { %v3390_v47 = vpop.f32.mrb[12].mxu1 }
 0x176   : > { %v2476_v62 = vpop.f32.mrb[13].mxu1  ;;  %v2504_v9 = vmul.f32 %v3390_v47, %v3048_v8 }
 0x177   : > { %v3391_v13 = vpop.f32.mrb[14].mxu1  ;;  %v2502_v28 = vmul.f32 %v3048_v8, %v2476_v62 }
 0x178   : > { %v2479_v63 = vpop.f32.mrb[15].mxu1  ;;  %v2505_v57 = vmul.f32 %v3391_v13, %v3048_v8 }
 0x179   : > { %v2503_v39 = vmul.f32 %v3048_v8, %v2479_v63 }
 0x180   : > { %v3376_v48 = vpop.f32.mrb[0].mxu0 }
 0x181   : > { %v3392_v53 = vadd.f32 %v3376_v48, %v3256_v42  ;;  %v2326_v24 = vpop.f32.mrb[1].mxu0 }
 0x182   : > { %v3393_v58 = vadd.f32 %v2326_v24, %v1171_v30  ;;  %v3377_v61 = vpop.f32.mrb[2].mxu0 }
 0x183   : > { %v2374_v59 = vmul.f32 %v3392_v53, %v3039_v52  ;;  %v3394_v3 = vadd.f32 %v3377_v61, %v3257_v43  ;;  %v2329_v7 = vpop.f32.mrb[3].mxu0 }
 0x184   : > { %v2372_v34 = vmul.f32 %v3393_v58, %v3039_v52  ;;  %v3395_v17 = vadd.f32 %v2329_v7, %v1174_v51 }
 0x185   : > { %v2508_v27 = vadd.f32 %v2500_v49, %v2374_v59  ;;  %v2375_v46 = vmul.f32 %v3394_v3, %v3039_v52 }
 0x186   : > { %v2506_v50 = vadd.f32 %v2498_v26, %v2372_v34  ;;  %v2373_v15 = vmul.f32 %v3395_v17, %v3039_v52 }
 0x187   : > { %v2523_v56 = vadd.f32 %v3049_v38, %v2508_v27  ;;  %v2509_v10 = vadd.f32 %v2501_v16, %v2375_v46 }
 0x188   : > { %v2521_v14 = vadd.f32 %v3049_v38, %v2506_v50  ;;  %v2507_v54 = vadd.f32 %v2499_v6, %v2373_v15  ;;  %v3380_v18 = vpop.f32.mrb[4].mxu0 }
 0x189   : > { %v2531_v19 = vmax.f32 %v2523_v56, 0.0  ;;  %v2524_v20 = vadd.f32 %v3049_v38, %v2509_v10  ;;  %v3396_v23 = vadd.f32 %v3380_v18, %v3260_v55  ;;  %v2342_v60 = vpop.f32.mrb[5].mxu0 }
 0x18a   : > { %v2529_v1 = vmax.f32 %v2521_v14, 0.0  ;;  %v2522_v25 = vadd.f32 %v3049_v38, %v2507_v54  ;;  %v3397_v40 = vadd.f32 %v2342_v60, %v1187_v44  ;;  %v3381_v32 = vpop.f32.mrb[6].mxu0 }
 0x18b   : > { %2539 = vst [vmem:[%s4239_s22 + $0x10] sm:$0xff] %v2531_v19  ;;  %v2532_v41 = vmax.f32 %v2524_v20, 0.0  ;;  %v2378_v11 = vmul.f32 %v3396_v23, %v3039_v52  ;;  %v3398_v21 = vadd.f32 %v3381_v32, %v3261_v22  ;;  %v2345_v4 = vpop.f32.mrb[7].mxu0 }
 0x18c   : > { %2537 = vst [vmem:[%s4239_s22] sm:$0xff] %v2529_v1  ;;  %v2530_v33 = vmax.f32 %v2522_v25, 0.0  ;;  %v2376_v5 = vmul.f32 %v3397_v40, %v3039_v52  ;;  %v3399_v35 = vadd.f32 %v2345_v4, %v1190_v0 }
 0x18d   : > { %2540 = vst [vmem:[%s4239_s22 + $0x18] sm:$0xff] %v2532_v41  ;;  %v2512_v31 = vadd.f32 %v2504_v9, %v2378_v11  ;;  %v2379_v36 = vmul.f32 %v3398_v21, %v3039_v52 }
 0x18e   : > { %2538 = vst [vmem:[%s4239_s22 + $0x8] sm:$0xff] %v2530_v33  ;;  %v2510_v37 = vadd.f32 %v2502_v28, %v2376_v5  ;;  %v2377_v42 = vmul.f32 %v3399_v35, %v3039_v52 }
 0x18f   : > { %v2527_v30 = vadd.f32 %v3049_v38, %v2512_v31  ;;  %v2513_v43 = vadd.f32 %v2505_v57, %v2379_v36 }
 0x190   : > { %v2525_v51 = vadd.f32 %v3049_v38, %v2510_v37  ;;  %v2511_v55 = vadd.f32 %v2503_v39, %v2377_v42 }
 0x191   : > { %v2535_v44 = vmax.f32 %v2527_v30, 0.0  ;;  %v2528_v22 = vadd.f32 %v3049_v38, %v2513_v43 }
 0x192   : > { %v2533_v2 = vmax.f32 %v2525_v51, 0.0  ;;  %v2526_v0 = vadd.f32 %v3049_v38, %v2511_v55 }
 0x193   : > { %2543 = vst [vmem:[%s4239_s22 + $0x30] sm:$0xff] %v2535_v44  ;;  %v2536_v12 = vmax.f32 %v2528_v22, 0.0 }
 0x194   : > { %2541 = vst [vmem:[%s4239_s22 + $0x20] sm:$0xff] %v2533_v2  ;;  %v2534_v45 = vmax.f32 %v2526_v0, 0.0 }
 0x195   : > { %2544 = vst [vmem:[%s4239_s22 + $0x38] sm:$0xff] %v2536_v12 }
 0x196   : > { %2542 = vst [vmem:[%s4239_s22 + $0x28] sm:$0xff] %v2534_v45 }
 0x197 PF: > { %s17_s26 = sadd.s32 1, %s3593_s26   ;;  %s4270_s24 = smov %s3589_s25 }
 0x198   : > { %p14_p5 = scmp.ge.s32.totalorder %s17_s26, 4   ;;  %s4271_s25 = smov %s4273_s27 }
 0x19a   :  { %16 = sbr.rel (!%p14_p5) target bundleno = 2 (0x2), region = 106 }

</bundles_post_ra>
